<compile_context>
chip_gen: v5e
topology: v5e:2x2
jax: 0.10.0
libtpu: 0.0.40
codegen_flags: <defaults>
</compile_context>

<pallas_src>
import functools

import jax
import jax.numpy as jnp
from jax.experimental import pallas as pl
from jax.experimental.pallas import tpu as pltpu


def _embedding_with_char_kernel(
    wproj_ref, cidx_ref, table_ref,
    gt0_w_ref, gt0_b_ref, gt1_w_ref, gt1_b_ref,
    conv_b_ref,
    out_ref,
    g_slab,
    *, K, L, W, H2, Vp,
):
    tn = wproj_ref.shape[0]

    # ---------------- word path: 2-layer HighwayEncoder (proj pre-folded) -----
    x = wproj_ref[...].astype(jnp.float32)
    for w_ref, b_ref in ((gt0_w_ref, gt0_b_ref), (gt1_w_ref, gt1_b_ref)):
        # fused [gate | transform] weights: one (tn, H2) @ (H2, 2*H2) bf16 dot
        gt = jnp.dot(x.astype(jnp.bfloat16), w_ref[...],
                     preferred_element_type=jnp.float32) + b_ref[...]
        g = jax.nn.sigmoid(gt[:, :H2])
        t = jnp.maximum(gt[:, H2:], 0.0)
        x = g * t + (1.0 - g) * x

    # ---------------- char path: gather pre-folded table, conv, relu, maxpool --
    # g_slab[w, n, k*H2:(k+1)*H2] = (char_vectors[c[n, w]] @ conv_w[k])  in bf16.
    # One-hot matmul selects bf16 table rows exactly (no extra rounding).
    cidx = cidx_ref[...]                                          # (tn, W) int32
    iota = jax.lax.broadcasted_iota(jnp.int32, (tn, Vp), 1)
    table = table_ref[...]                                        # (Vp, K*H2) bf16
    for w in range(W):                                            # static unroll
        onehot = (cidx[:, w:w + 1] == iota).astype(jnp.bfloat16)  # (tn, Vp)
        g_slab[w] = jnp.dot(onehot, table,
                            preferred_element_type=jnp.float32
                            ).astype(jnp.bfloat16)

    # conv[p] = sum_k table[c[:, p+k], k-th H2 slice]; running max over the L
    # positions; bias + ReLU hoisted out (max commutes with +b, ReLU monotone).
    m = None
    for p in range(L):                                            # static unroll
        a = g_slab[p, :, 0:H2].astype(jnp.float32)
        for k in range(1, K):
            a = a + g_slab[p + k, :, k * H2:(k + 1) * H2].astype(jnp.float32)
        m = a if m is None else jnp.maximum(m, a)
    conv_out = jnp.maximum(m + conv_b_ref[...], 0.0)

    # Char Highway is an identity; single lane-0-aligned full-width store.
    out_ref[...] = jnp.concatenate([x, conv_out], axis=-1)


def embedding_with_char(w_idxs, c_idxs, params, *, tn=512):
    """w_idxs: (B, S) int32, c_idxs: (B, S, W) int32 -> (B, S, hidden) f32."""
    B, S = w_idxs.shape
    W = c_idxs.shape[-1]
    word_vectors = params["word_vectors"]
    char_vectors = params["char_vectors"]
    H2 = params["proj_w"].shape[1]
    K = params["conv_w"].shape[0]
    L = W - K + 1
    N = B * S
    Vc = char_vectors.shape[0]
    Vp = max(128, -(-Vc // 128) * 128)        # pad vocab to a full lane tile

    # Row tile: multiple of 8, clamped to N; keep >= 2 tiles when possible so
    # the single "parallel" grid axis can shard across both TCs on v7x.
    tn = max(8, min(int(tn), ((N + 7) // 8) * 8))
    tn = (tn // 8) * 8
    if N > 8 and -(-N // tn) < 2:
        tn = max(8, ((-(-N // 2) + 7) // 8) * 8)
    n_tiles = -(-N // tn)
    Np = n_tiles * tn

    w_flat = w_idxs.reshape(N).astype(jnp.int32)
    c_flat = c_idxs.reshape(N, W).astype(jnp.int32)
    if Np != N:
        w_flat = jnp.pad(w_flat, (0, Np - N))
        c_flat = jnp.pad(c_flat, ((0, Np - N), (0, 0)))

    # ---- one-time wrapper-side folding (amortized over inference) ----
    # word: fold proj into the embedding table; gather projected rows in bf16.
    wproj_tbl = (word_vectors @ params["proj_w"]).astype(jnp.bfloat16)    # (Vw, H2)
    wproj = wproj_tbl[w_flat]                                             # (Np, H2)
    # char: fold conv weights into the char table -> (Vp, K*H2) bf16, VMEM-resident.
    char_tbl = jnp.einsum("vd,kdh->vkh", char_vectors,
                          params["conv_w"]).reshape(Vc, K * H2)
    char_tbl = jnp.pad(char_tbl, ((0, Vp - Vc), (0, 0))).astype(jnp.bfloat16)
    # highway: fused [gate | transform] weights (bf16) and biases (f32).
    gt0_w = jnp.concatenate([params["g0_w"], params["t0_w"]], axis=1).astype(jnp.bfloat16)
    gt1_w = jnp.concatenate([params["g1_w"], params["t1_w"]], axis=1).astype(jnp.bfloat16)
    gt0_b = jnp.concatenate([params["g0_b"], params["t0_b"]], axis=1)
    gt1_b = jnp.concatenate([params["g1_b"], params["t1_b"]], axis=1)
    conv_b = params["conv_b"]

    def full_spec(shape):
        return pl.BlockSpec(shape, lambda i, _n=len(shape): (0,) * _n)

    in_specs = [
        pl.BlockSpec((tn, H2), lambda i: (i, 0)),        # projected word rows (bf16)
        pl.BlockSpec((tn, W), lambda i: (i, 0)),         # char indices (int32)
        full_spec((Vp, K * H2)),                         # folded char x conv table
        full_spec((H2, 2 * H2)), full_spec((1, 2 * H2)), # fused gate|transform 0
        full_spec((H2, 2 * H2)), full_spec((1, 2 * H2)), # fused gate|transform 1
        full_spec((1, H2)),                              # conv bias
    ]

    out = pl.pallas_call(
        functools.partial(_embedding_with_char_kernel,
                          K=K, L=L, W=W, H2=H2, Vp=Vp),
        out_shape=jax.ShapeDtypeStruct((Np, 2 * H2), jnp.float32),
        grid=(n_tiles,),
        in_specs=in_specs,
        out_specs=pl.BlockSpec((tn, 2 * H2), lambda i: (i, 0)),
        scratch_shapes=[pltpu.VMEM((W, tn, K * H2), jnp.bfloat16)],
        compiler_params=pltpu.CompilerParams(
            dimension_semantics=("parallel",),
            vmem_limit_bytes=32 * 1024 * 1024),
    )(wproj, c_flat, char_tbl, gt0_w, gt0_b, gt1_w, gt1_b, conv_b)
    return out[:N].reshape(B, S, 2 * H2)


def reference(w_idxs, c_idxs, p):
    """Pure-JAX f32 reference of the PyTorch forward (eval mode), literal graph."""
    # word path
    x = p["word_vectors"][w_idxs] @ p["proj_w"]
    for gw, gb, tw, tb in (
        (p["g0_w"], p["g0_b"], p["t0_w"], p["t0_b"]),
        (p["g1_w"], p["g1_b"], p["t1_w"], p["t1_b"]),
    ):
        g = jax.nn.sigmoid(x @ gw + gb)
        t = jax.nn.relu(x @ tw + tb)
        x = g * t + (1.0 - g) * x
    word = x                                                   # (B,S,H2)
    # char path
    ce = p["char_vectors"][c_idxs]                             # (B,S,W,Dc)
    B, S, W, Dc = ce.shape
    cef = ce.reshape(B * S, W, Dc)
    K = p["conv_w"].shape[0]
    L = W - K + 1
    conv = jnp.stack(
        [sum(cef[:, pp + k, :] @ p["conv_w"][k] for k in range(K)) + p["conv_b"]
         for pp in range(L)], axis=1)                          # (N, L, H2)
    conv_out = jnp.max(jax.nn.relu(conv), axis=1)              # (N, H2)
    gate = jax.nn.sigmoid(conv_out @ p["hw_gate_w"] + p["hw_gate_b"])
    char = (gate * conv_out + (1.0 - gate) * conv_out).reshape(B, S, -1)
    return jnp.concatenate([word, char], axis=-1)


def make_params(key, *, word_vocab, Dw, char_vocab, Dc, hidden, K):
    H2 = hidden // 2
    ks = jax.random.split(key, 16)
    u = lambda k, shape, s=0.1: jax.random.uniform(k, shape, jnp.float32, -s, s)
    return {
        "word_vectors": u(ks[0], (word_vocab, Dw), 0.5),
        "char_vectors": u(ks[1], (char_vocab, Dc), 0.5),
        "proj_w": u(ks[2], (Dw, H2)),
        "g0_w": u(ks[3], (H2, H2)), "g0_b": u(ks[4], (1, H2)),
        "t0_w": u(ks[5], (H2, H2)), "t0_b": u(ks[6], (1, H2)),
        "g1_w": u(ks[7], (H2, H2)), "g1_b": u(ks[8], (1, H2)),
        "t1_w": u(ks[9], (H2, H2)), "t1_b": u(ks[10], (1, H2)),
        "conv_w": u(ks[11], (K, Dc, H2)), "conv_b": u(ks[12], (1, H2)),
        "hw_gate_w": u(ks[13], (H2, H2)), "hw_gate_b": u(ks[14], (1, H2)),
    }


if __name__ == "__main__":
    B, S = 2, 8                 # batch, sequence length
    W = 16                      # char_limit (max word length)
    hidden = 64                 # hidden_size -> word/char halves of 32 each
    Dw, Dc = 48, 64             # word / char embedding dims
    word_vocab, char_vocab = 100, 60
    K = 5                       # conv kernel size

    key = jax.random.PRNGKey(0)
    kp, kw, kc = jax.random.split(key, 3)
    params = make_params(kp, word_vocab=word_vocab, Dw=Dw,
                         char_vocab=char_vocab, Dc=Dc, hidden=hidden, K=K)
    w_idxs = jax.random.randint(kw, (B, S), 0, word_vocab, dtype=jnp.int32)
    c_idxs = jax.random.randint(kc, (B, S, W), 0, char_vocab, dtype=jnp.int32)

    out = embedding_with_char(w_idxs, c_idxs, params)
    out = jax.block_until_ready(out)

    ref = reference(w_idxs, c_idxs, params)
    assert out.shape == (B, S, hidden), out.shape
    # bf16 inputs/weights (f32 accumulation) -> slightly looser tolerance vs f32 ref
    assert jnp.allclose(out, ref, rtol=2e-2, atol=5e-3), "mismatch vs reference"

    print("KERNEL_OK")
</pallas_src>

<mosaic_0001>
module attributes {stable_mosaic.version = 11 : i64} {
  func.func @_embedding_with_char_kernel(%arg0: i32, %arg1: memref<8x32xbf16, #tpu.memory_space<vmem>>, %arg2: memref<8x16xi32, #tpu.memory_space<vmem>>, %arg3: memref<128x160xbf16, #tpu.memory_space<vmem>>, %arg4: memref<32x64xbf16, #tpu.memory_space<vmem>>, %arg5: memref<1x64xf32, #tpu.memory_space<vmem>>, %arg6: memref<32x64xbf16, #tpu.memory_space<vmem>>, %arg7: memref<1x64xf32, #tpu.memory_space<vmem>>, %arg8: memref<1x32xf32, #tpu.memory_space<vmem>>, %arg9: memref<8x64xf32, #tpu.memory_space<vmem>>, %arg10: memref<16x8x160xbf16, #tpu.memory_space<vmem>>) attributes {dimension_semantics = [#tpu.dimension_semantics<parallel>], iteration_bounds = array<i64: 2>, scalar_prefetch = 0 : i64, scratch_operands = 1 : i64, tpu.core_type = #tpu.core_type<tc>, window_params = [{transform_indices = @transform_0, window_bounds = array<i64: 8, 32>}, {transform_indices = @transform_1, window_bounds = array<i64: 8, 16>}, {pipeline_mode = #tpu.pipeline_mode<synchronous>, transform_indices = @transform_2, window_bounds = array<i64: 128, 160>}, {pipeline_mode = #tpu.pipeline_mode<synchronous>, transform_indices = @transform_3, window_bounds = array<i64: 32, 64>}, {pipeline_mode = #tpu.pipeline_mode<synchronous>, transform_indices = @transform_4, window_bounds = array<i64: 1, 64>}, {pipeline_mode = #tpu.pipeline_mode<synchronous>, transform_indices = @transform_5, window_bounds = array<i64: 32, 64>}, {pipeline_mode = #tpu.pipeline_mode<synchronous>, transform_indices = @transform_6, window_bounds = array<i64: 1, 64>}, {pipeline_mode = #tpu.pipeline_mode<synchronous>, transform_indices = @transform_7, window_bounds = array<i64: 1, 32>}, {transform_indices = @transform_8, window_bounds = array<i64: 8, 64>}]} {
    %c0 = arith.constant 0 : index
    %c0_0 = arith.constant 0 : index
    %0 = vector.load %arg1[%c0, %c0_0] : memref<8x32xbf16, #tpu.memory_space<vmem>>, vector<8x32xbf16>
    %1 = arith.extf %0 : vector<8x32xbf16> to vector<8x32xf32>
    %2 = arith.truncf %1 : vector<8x32xf32> to vector<8x32xbf16>
    %c0_1 = arith.constant 0 : index
    %c0_2 = arith.constant 0 : index
    %3 = vector.load %arg4[%c0_1, %c0_2] : memref<32x64xbf16, #tpu.memory_space<vmem>>, vector<32x64xbf16>
    %cst = arith.constant dense<0.000000e+00> : vector<8x64xf32>
    %4 = tpu.matmul %2, %3, %cst {dimension_numbers = #tpu.dot_dimension_numbers<[1], [0], [0], [1], [0, 0, 1, 1], [], []>} : vector<8x32xbf16>, vector<32x64xbf16>, vector<8x64xf32> -> vector<8x64xf32>
    %c0_3 = arith.constant 0 : index
    %c0_4 = arith.constant 0 : index
    %5 = vector.load %arg5[%c0_3, %c0_4] : memref<1x64xf32, #tpu.memory_space<vmem>>, vector<1x64xf32>
    %6 = vector.broadcast %5 : vector<1x64xf32> to vector<8x64xf32>
    %7 = arith.addf %4, %6 : vector<8x64xf32>
    %8 = vector.extract_strided_slice %7 {offsets = [0, 0], sizes = [8, 32], strides = [1, 1]} : vector<8x64xf32> to vector<8x32xf32>
    %9 = arith.negf %8 : vector<8x32xf32>
    %10 = math.exp %9 : vector<8x32xf32>
    %cst_5 = arith.constant 1.000000e+00 : f32
    %11 = vector.broadcast %cst_5 : f32 to vector<8x32xf32>
    %12 = arith.addf %11, %10 : vector<8x32xf32>
    %13 = arith.divf %11, %12 : vector<8x32xf32>
    %14 = vector.extract_strided_slice %7 {offsets = [0, 32], sizes = [8, 32], strides = [1, 1]} : vector<8x64xf32> to vector<8x32xf32>
    %cst_6 = arith.constant 0.000000e+00 : f32
    %15 = vector.broadcast %cst_6 : f32 to vector<8x32xf32>
    %16 = arith.maximumf %14, %15 : vector<8x32xf32>
    %17 = arith.mulf %13, %16 : vector<8x32xf32>
    %cst_7 = arith.constant 1.000000e+00 : f32
    %18 = vector.broadcast %cst_7 : f32 to vector<8x32xf32>
    %19 = arith.subf %18, %13 : vector<8x32xf32>
    %20 = arith.mulf %19, %1 : vector<8x32xf32>
    %21 = arith.addf %17, %20 : vector<8x32xf32>
    %22 = arith.truncf %21 : vector<8x32xf32> to vector<8x32xbf16>
    %c0_8 = arith.constant 0 : index
    %c0_9 = arith.constant 0 : index
    %23 = vector.load %arg6[%c0_8, %c0_9] : memref<32x64xbf16, #tpu.memory_space<vmem>>, vector<32x64xbf16>
    %cst_10 = arith.constant dense<0.000000e+00> : vector<8x64xf32>
    %24 = tpu.matmul %22, %23, %cst_10 {dimension_numbers = #tpu.dot_dimension_numbers<[1], [0], [0], [1], [0, 0, 1, 1], [], []>} : vector<8x32xbf16>, vector<32x64xbf16>, vector<8x64xf32> -> vector<8x64xf32>
    %c0_11 = arith.constant 0 : index
    %c0_12 = arith.constant 0 : index
    %25 = vector.load %arg7[%c0_11, %c0_12] : memref<1x64xf32, #tpu.memory_space<vmem>>, vector<1x64xf32>
    %26 = vector.broadcast %25 : vector<1x64xf32> to vector<8x64xf32>
    %27 = arith.addf %24, %26 : vector<8x64xf32>
    %28 = vector.extract_strided_slice %27 {offsets = [0, 0], sizes = [8, 32], strides = [1, 1]} : vector<8x64xf32> to vector<8x32xf32>
    %29 = arith.negf %28 : vector<8x32xf32>
    %30 = math.exp %29 : vector<8x32xf32>
    %cst_13 = arith.constant 1.000000e+00 : f32
    %31 = vector.broadcast %cst_13 : f32 to vector<8x32xf32>
    %32 = arith.addf %31, %30 : vector<8x32xf32>
    %33 = arith.divf %31, %32 : vector<8x32xf32>
    %34 = vector.extract_strided_slice %27 {offsets = [0, 32], sizes = [8, 32], strides = [1, 1]} : vector<8x64xf32> to vector<8x32xf32>
    %cst_14 = arith.constant 0.000000e+00 : f32
    %35 = vector.broadcast %cst_14 : f32 to vector<8x32xf32>
    %36 = arith.maximumf %34, %35 : vector<8x32xf32>
    %37 = arith.mulf %33, %36 : vector<8x32xf32>
    %cst_15 = arith.constant 1.000000e+00 : f32
    %38 = vector.broadcast %cst_15 : f32 to vector<8x32xf32>
    %39 = arith.subf %38, %33 : vector<8x32xf32>
    %40 = arith.mulf %39, %21 : vector<8x32xf32>
    %41 = arith.addf %37, %40 : vector<8x32xf32>
    %c0_16 = arith.constant 0 : index
    %c0_17 = arith.constant 0 : index
    %42 = vector.load %arg2[%c0_16, %c0_17] : memref<8x16xi32, #tpu.memory_space<vmem>>, vector<8x16xi32>
    %43 = tpu.iota {dimensions = array<i32: 1>} : vector<8x128xi32>
    %c0_18 = arith.constant 0 : index
    %c0_19 = arith.constant 0 : index
    %44 = vector.load %arg3[%c0_18, %c0_19] : memref<128x160xbf16, #tpu.memory_space<vmem>>, vector<128x160xbf16>
    %45 = vector.extract_strided_slice %42 {offsets = [0, 0], sizes = [8, 1], strides = [1, 1]} : vector<8x16xi32> to vector<8x1xi32>
    %46 = vector.broadcast %45 : vector<8x1xi32> to vector<8x128xi32>
    %47 = arith.cmpi eq, %46, %43 : vector<8x128xi32>
    %48 = arith.extui %47 : vector<8x128xi1> to vector<8x128xi32>
    %49 = arith.sitofp %48 : vector<8x128xi32> to vector<8x128xf32>
    %50 = arith.truncf %49 : vector<8x128xf32> to vector<8x128xbf16>
    %cst_20 = arith.constant dense<0.000000e+00> : vector<8x160xf32>
    %51 = tpu.matmul %50, %44, %cst_20 {dimension_numbers = #tpu.dot_dimension_numbers<[1], [0], [0], [1], [0, 0, 1, 1], [], []>} : vector<8x128xbf16>, vector<128x160xbf16>, vector<8x160xf32> -> vector<8x160xf32>
    %52 = arith.truncf %51 : vector<8x160xf32> to vector<8x160xbf16>
    %c0_21 = arith.constant 0 : index
    %c0_22 = arith.constant 0 : index
    %c0_23 = arith.constant 0 : index
    %53 = vector.load %arg10[%c0_21, %c0_22, %c0_23] : memref<16x8x160xbf16, #tpu.memory_space<vmem>>, vector<1x8x160xbf16>
    %54 = vector.shape_cast %53 : vector<1x8x160xbf16> to vector<8x160xbf16>
    %55 = vector.shape_cast %52 : vector<8x160xbf16> to vector<1x8x160xbf16>
    tpu.vector_store %arg10[%c0_21, %c0_22, %c0_23], %55 {strides = array<i32>} : memref<16x8x160xbf16, #tpu.memory_space<vmem>>, vector<1x8x160xbf16>,
    %56 = vector.extract_strided_slice %42 {offsets = [0, 1], sizes = [8, 1], strides = [1, 1]} : vector<8x16xi32> to vector<8x1xi32>
    %57 = vector.broadcast %56 : vector<8x1xi32> to vector<8x128xi32>
    %58 = arith.cmpi eq, %57, %43 : vector<8x128xi32>
    %59 = arith.extui %58 : vector<8x128xi1> to vector<8x128xi32>
    %60 = arith.sitofp %59 : vector<8x128xi32> to vector<8x128xf32>
    %61 = arith.truncf %60 : vector<8x128xf32> to vector<8x128xbf16>
    %cst_24 = arith.constant dense<0.000000e+00> : vector<8x160xf32>
    %62 = tpu.matmul %61, %44, %cst_24 {dimension_numbers = #tpu.dot_dimension_numbers<[1], [0], [0], [1], [0, 0, 1, 1], [], []>} : vector<8x128xbf16>, vector<128x160xbf16>, vector<8x160xf32> -> vector<8x160xf32>
    %63 = arith.truncf %62 : vector<8x160xf32> to vector<8x160xbf16>
    %c1 = arith.constant 1 : index
    %c0_25 = arith.constant 0 : index
    %c0_26 = arith.constant 0 : index
    %64 = vector.load %arg10[%c1, %c0_25, %c0_26] : memref<16x8x160xbf16, #tpu.memory_space<vmem>>, vector<1x8x160xbf16>
    %65 = vector.shape_cast %64 : vector<1x8x160xbf16> to vector<8x160xbf16>
    %66 = vector.shape_cast %63 : vector<8x160xbf16> to vector<1x8x160xbf16>
    tpu.vector_store %arg10[%c1, %c0_25, %c0_26], %66 {strides = array<i32>} : memref<16x8x160xbf16, #tpu.memory_space<vmem>>, vector<1x8x160xbf16>,
    %67 = vector.extract_strided_slice %42 {offsets = [0, 2], sizes = [8, 1], strides = [1, 1]} : vector<8x16xi32> to vector<8x1xi32>
    %68 = vector.broadcast %67 : vector<8x1xi32> to vector<8x128xi32>
    %69 = arith.cmpi eq, %68, %43 : vector<8x128xi32>
    %70 = arith.extui %69 : vector<8x128xi1> to vector<8x128xi32>
    %71 = arith.sitofp %70 : vector<8x128xi32> to vector<8x128xf32>
    %72 = arith.truncf %71 : vector<8x128xf32> to vector<8x128xbf16>
    %cst_27 = arith.constant dense<0.000000e+00> : vector<8x160xf32>
    %73 = tpu.matmul %72, %44, %cst_27 {dimension_numbers = #tpu.dot_dimension_numbers<[1], [0], [0], [1], [0, 0, 1, 1], [], []>} : vector<8x128xbf16>, vector<128x160xbf16>, vector<8x160xf32> -> vector<8x160xf32>
    %74 = arith.truncf %73 : vector<8x160xf32> to vector<8x160xbf16>
    %c2 = arith.constant 2 : index
    %c0_28 = arith.constant 0 : index
    %c0_29 = arith.constant 0 : index
    %75 = vector.load %arg10[%c2, %c0_28, %c0_29] : memref<16x8x160xbf16, #tpu.memory_space<vmem>>, vector<1x8x160xbf16>
    %76 = vector.shape_cast %75 : vector<1x8x160xbf16> to vector<8x160xbf16>
    %77 = vector.shape_cast %74 : vector<8x160xbf16> to vector<1x8x160xbf16>
    tpu.vector_store %arg10[%c2, %c0_28, %c0_29], %77 {strides = array<i32>} : memref<16x8x160xbf16, #tpu.memory_space<vmem>>, vector<1x8x160xbf16>,
    %78 = vector.extract_strided_slice %42 {offsets = [0, 3], sizes = [8, 1], strides = [1, 1]} : vector<8x16xi32> to vector<8x1xi32>
    %79 = vector.broadcast %78 : vector<8x1xi32> to vector<8x128xi32>
    %80 = arith.cmpi eq, %79, %43 : vector<8x128xi32>
    %81 = arith.extui %80 : vector<8x128xi1> to vector<8x128xi32>
    %82 = arith.sitofp %81 : vector<8x128xi32> to vector<8x128xf32>
    %83 = arith.truncf %82 : vector<8x128xf32> to vector<8x128xbf16>
    %cst_30 = arith.constant dense<0.000000e+00> : vector<8x160xf32>
    %84 = tpu.matmul %83, %44, %cst_30 {dimension_numbers = #tpu.dot_dimension_numbers<[1], [0], [0], [1], [0, 0, 1, 1], [], []>} : vector<8x128xbf16>, vector<128x160xbf16>, vector<8x160xf32> -> vector<8x160xf32>
    %85 = arith.truncf %84 : vector<8x160xf32> to vector<8x160xbf16>
    %c3 = arith.constant 3 : index
    %c0_31 = arith.constant 0 : index
    %c0_32 = arith.constant 0 : index
    %86 = vector.load %arg10[%c3, %c0_31, %c0_32] : memref<16x8x160xbf16, #tpu.memory_space<vmem>>, vector<1x8x160xbf16>
    %87 = vector.shape_cast %86 : vector<1x8x160xbf16> to vector<8x160xbf16>
    %88 = vector.shape_cast %85 : vector<8x160xbf16> to vector<1x8x160xbf16>
    tpu.vector_store %arg10[%c3, %c0_31, %c0_32], %88 {strides = array<i32>} : memref<16x8x160xbf16, #tpu.memory_space<vmem>>, vector<1x8x160xbf16>,
    %89 = vector.extract_strided_slice %42 {offsets = [0, 4], sizes = [8, 1], strides = [1, 1]} : vector<8x16xi32> to vector<8x1xi32>
    %90 = vector.broadcast %89 : vector<8x1xi32> to vector<8x128xi32>
    %91 = arith.cmpi eq, %90, %43 : vector<8x128xi32>
    %92 = arith.extui %91 : vector<8x128xi1> to vector<8x128xi32>
    %93 = arith.sitofp %92 : vector<8x128xi32> to vector<8x128xf32>
    %94 = arith.truncf %93 : vector<8x128xf32> to vector<8x128xbf16>
    %cst_33 = arith.constant dense<0.000000e+00> : vector<8x160xf32>
    %95 = tpu.matmul %94, %44, %cst_33 {dimension_numbers = #tpu.dot_dimension_numbers<[1], [0], [0], [1], [0, 0, 1, 1], [], []>} : vector<8x128xbf16>, vector<128x160xbf16>, vector<8x160xf32> -> vector<8x160xf32>
    %96 = arith.truncf %95 : vector<8x160xf32> to vector<8x160xbf16>
    %c4 = arith.constant 4 : index
    %c0_34 = arith.constant 0 : index
    %c0_35 = arith.constant 0 : index
    %97 = vector.load %arg10[%c4, %c0_34, %c0_35] : memref<16x8x160xbf16, #tpu.memory_space<vmem>>, vector<1x8x160xbf16>
    %98 = vector.shape_cast %97 : vector<1x8x160xbf16> to vector<8x160xbf16>
    %99 = vector.shape_cast %96 : vector<8x160xbf16> to vector<1x8x160xbf16>
    tpu.vector_store %arg10[%c4, %c0_34, %c0_35], %99 {strides = array<i32>} : memref<16x8x160xbf16, #tpu.memory_space<vmem>>, vector<1x8x160xbf16>,
    %100 = vector.extract_strided_slice %42 {offsets = [0, 5], sizes = [8, 1], strides = [1, 1]} : vector<8x16xi32> to vector<8x1xi32>
    %101 = vector.broadcast %100 : vector<8x1xi32> to vector<8x128xi32>
    %102 = arith.cmpi eq, %101, %43 : vector<8x128xi32>
    %103 = arith.extui %102 : vector<8x128xi1> to vector<8x128xi32>
    %104 = arith.sitofp %103 : vector<8x128xi32> to vector<8x128xf32>
    %105 = arith.truncf %104 : vector<8x128xf32> to vector<8x128xbf16>
    %cst_36 = arith.constant dense<0.000000e+00> : vector<8x160xf32>
    %106 = tpu.matmul %105, %44, %cst_36 {dimension_numbers = #tpu.dot_dimension_numbers<[1], [0], [0], [1], [0, 0, 1, 1], [], []>} : vector<8x128xbf16>, vector<128x160xbf16>, vector<8x160xf32> -> vector<8x160xf32>
    %107 = arith.truncf %106 : vector<8x160xf32> to vector<8x160xbf16>
    %c5 = arith.constant 5 : index
    %c0_37 = arith.constant 0 : index
    %c0_38 = arith.constant 0 : index
    %108 = vector.load %arg10[%c5, %c0_37, %c0_38] : memref<16x8x160xbf16, #tpu.memory_space<vmem>>, vector<1x8x160xbf16>
    %109 = vector.shape_cast %108 : vector<1x8x160xbf16> to vector<8x160xbf16>
    %110 = vector.shape_cast %107 : vector<8x160xbf16> to vector<1x8x160xbf16>
    tpu.vector_store %arg10[%c5, %c0_37, %c0_38], %110 {strides = array<i32>} : memref<16x8x160xbf16, #tpu.memory_space<vmem>>, vector<1x8x160xbf16>,
    %111 = vector.extract_strided_slice %42 {offsets = [0, 6], sizes = [8, 1], strides = [1, 1]} : vector<8x16xi32> to vector<8x1xi32>
    %112 = vector.broadcast %111 : vector<8x1xi32> to vector<8x128xi32>
    %113 = arith.cmpi eq, %112, %43 : vector<8x128xi32>
    %114 = arith.extui %113 : vector<8x128xi1> to vector<8x128xi32>
    %115 = arith.sitofp %114 : vector<8x128xi32> to vector<8x128xf32>
    %116 = arith.truncf %115 : vector<8x128xf32> to vector<8x128xbf16>
    %cst_39 = arith.constant dense<0.000000e+00> : vector<8x160xf32>
    %117 = tpu.matmul %116, %44, %cst_39 {dimension_numbers = #tpu.dot_dimension_numbers<[1], [0], [0], [1], [0, 0, 1, 1], [], []>} : vector<8x128xbf16>, vector<128x160xbf16>, vector<8x160xf32> -> vector<8x160xf32>
    %118 = arith.truncf %117 : vector<8x160xf32> to vector<8x160xbf16>
    %c6 = arith.constant 6 : index
    %c0_40 = arith.constant 0 : index
    %c0_41 = arith.constant 0 : index
    %119 = vector.load %arg10[%c6, %c0_40, %c0_41] : memref<16x8x160xbf16, #tpu.memory_space<vmem>>, vector<1x8x160xbf16>
    %120 = vector.shape_cast %119 : vector<1x8x160xbf16> to vector<8x160xbf16>
    %121 = vector.shape_cast %118 : vector<8x160xbf16> to vector<1x8x160xbf16>
    tpu.vector_store %arg10[%c6, %c0_40, %c0_41], %121 {strides = array<i32>} : memref<16x8x160xbf16, #tpu.memory_space<vmem>>, vector<1x8x160xbf16>,
    %122 = vector.extract_strided_slice %42 {offsets = [0, 7], sizes = [8, 1], strides = [1, 1]} : vector<8x16xi32> to vector<8x1xi32>
    %123 = vector.broadcast %122 : vector<8x1xi32> to vector<8x128xi32>
    %124 = arith.cmpi eq, %123, %43 : vector<8x128xi32>
    %125 = arith.extui %124 : vector<8x128xi1> to vector<8x128xi32>
    %126 = arith.sitofp %125 : vector<8x128xi32> to vector<8x128xf32>
    %127 = arith.truncf %126 : vector<8x128xf32> to vector<8x128xbf16>
    %cst_42 = arith.constant dense<0.000000e+00> : vector<8x160xf32>
    %128 = tpu.matmul %127, %44, %cst_42 {dimension_numbers = #tpu.dot_dimension_numbers<[1], [0], [0], [1], [0, 0, 1, 1], [], []>} : vector<8x128xbf16>, vector<128x160xbf16>, vector<8x160xf32> -> vector<8x160xf32>
    %129 = arith.truncf %128 : vector<8x160xf32> to vector<8x160xbf16>
    %c7 = arith.constant 7 : index
    %c0_43 = arith.constant 0 : index
    %c0_44 = arith.constant 0 : index
    %130 = vector.load %arg10[%c7, %c0_43, %c0_44] : memref<16x8x160xbf16, #tpu.memory_space<vmem>>, vector<1x8x160xbf16>
    %131 = vector.shape_cast %130 : vector<1x8x160xbf16> to vector<8x160xbf16>
    %132 = vector.shape_cast %129 : vector<8x160xbf16> to vector<1x8x160xbf16>
    tpu.vector_store %arg10[%c7, %c0_43, %c0_44], %132 {strides = array<i32>} : memref<16x8x160xbf16, #tpu.memory_space<vmem>>, vector<1x8x160xbf16>,
    %133 = vector.extract_strided_slice %42 {offsets = [0, 8], sizes = [8, 1], strides = [1, 1]} : vector<8x16xi32> to vector<8x1xi32>
    %134 = vector.broadcast %133 : vector<8x1xi32> to vector<8x128xi32>
    %135 = arith.cmpi eq, %134, %43 : vector<8x128xi32>
    %136 = arith.extui %135 : vector<8x128xi1> to vector<8x128xi32>
    %137 = arith.sitofp %136 : vector<8x128xi32> to vector<8x128xf32>
    %138 = arith.truncf %137 : vector<8x128xf32> to vector<8x128xbf16>
    %cst_45 = arith.constant dense<0.000000e+00> : vector<8x160xf32>
    %139 = tpu.matmul %138, %44, %cst_45 {dimension_numbers = #tpu.dot_dimension_numbers<[1], [0], [0], [1], [0, 0, 1, 1], [], []>} : vector<8x128xbf16>, vector<128x160xbf16>, vector<8x160xf32> -> vector<8x160xf32>
    %140 = arith.truncf %139 : vector<8x160xf32> to vector<8x160xbf16>
    %c8 = arith.constant 8 : index
    %c0_46 = arith.constant 0 : index
    %c0_47 = arith.constant 0 : index
    %141 = vector.load %arg10[%c8, %c0_46, %c0_47] : memref<16x8x160xbf16, #tpu.memory_space<vmem>>, vector<1x8x160xbf16>
    %142 = vector.shape_cast %141 : vector<1x8x160xbf16> to vector<8x160xbf16>
    %143 = vector.shape_cast %140 : vector<8x160xbf16> to vector<1x8x160xbf16>
    tpu.vector_store %arg10[%c8, %c0_46, %c0_47], %143 {strides = array<i32>} : memref<16x8x160xbf16, #tpu.memory_space<vmem>>, vector<1x8x160xbf16>,
    %144 = vector.extract_strided_slice %42 {offsets = [0, 9], sizes = [8, 1], strides = [1, 1]} : vector<8x16xi32> to vector<8x1xi32>
    %145 = vector.broadcast %144 : vector<8x1xi32> to vector<8x128xi32>
    %146 = arith.cmpi eq, %145, %43 : vector<8x128xi32>
    %147 = arith.extui %146 : vector<8x128xi1> to vector<8x128xi32>
    %148 = arith.sitofp %147 : vector<8x128xi32> to vector<8x128xf32>
    %149 = arith.truncf %148 : vector<8x128xf32> to vector<8x128xbf16>
    %cst_48 = arith.constant dense<0.000000e+00> : vector<8x160xf32>
    %150 = tpu.matmul %149, %44, %cst_48 {dimension_numbers = #tpu.dot_dimension_numbers<[1], [0], [0], [1], [0, 0, 1, 1], [], []>} : vector<8x128xbf16>, vector<128x160xbf16>, vector<8x160xf32> -> vector<8x160xf32>
    %151 = arith.truncf %150 : vector<8x160xf32> to vector<8x160xbf16>
    %c9 = arith.constant 9 : index
    %c0_49 = arith.constant 0 : index
    %c0_50 = arith.constant 0 : index
    %152 = vector.load %arg10[%c9, %c0_49, %c0_50] : memref<16x8x160xbf16, #tpu.memory_space<vmem>>, vector<1x8x160xbf16>
    %153 = vector.shape_cast %152 : vector<1x8x160xbf16> to vector<8x160xbf16>
    %154 = vector.shape_cast %151 : vector<8x160xbf16> to vector<1x8x160xbf16>
    tpu.vector_store %arg10[%c9, %c0_49, %c0_50], %154 {strides = array<i32>} : memref<16x8x160xbf16, #tpu.memory_space<vmem>>, vector<1x8x160xbf16>,
    %155 = vector.extract_strided_slice %42 {offsets = [0, 10], sizes = [8, 1], strides = [1, 1]} : vector<8x16xi32> to vector<8x1xi32>
    %156 = vector.broadcast %155 : vector<8x1xi32> to vector<8x128xi32>
    %157 = arith.cmpi eq, %156, %43 : vector<8x128xi32>
    %158 = arith.extui %157 : vector<8x128xi1> to vector<8x128xi32>
    %159 = arith.sitofp %158 : vector<8x128xi32> to vector<8x128xf32>
    %160 = arith.truncf %159 : vector<8x128xf32> to vector<8x128xbf16>
    %cst_51 = arith.constant dense<0.000000e+00> : vector<8x160xf32>
    %161 = tpu.matmul %160, %44, %cst_51 {dimension_numbers = #tpu.dot_dimension_numbers<[1], [0], [0], [1], [0, 0, 1, 1], [], []>} : vector<8x128xbf16>, vector<128x160xbf16>, vector<8x160xf32> -> vector<8x160xf32>
    %162 = arith.truncf %161 : vector<8x160xf32> to vector<8x160xbf16>
    %c10 = arith.constant 10 : index
    %c0_52 = arith.constant 0 : index
    %c0_53 = arith.constant 0 : index
    %163 = vector.load %arg10[%c10, %c0_52, %c0_53] : memref<16x8x160xbf16, #tpu.memory_space<vmem>>, vector<1x8x160xbf16>
    %164 = vector.shape_cast %163 : vector<1x8x160xbf16> to vector<8x160xbf16>
    %165 = vector.shape_cast %162 : vector<8x160xbf16> to vector<1x8x160xbf16>
    tpu.vector_store %arg10[%c10, %c0_52, %c0_53], %165 {strides = array<i32>} : memref<16x8x160xbf16, #tpu.memory_space<vmem>>, vector<1x8x160xbf16>,
    %166 = vector.extract_strided_slice %42 {offsets = [0, 11], sizes = [8, 1], strides = [1, 1]} : vector<8x16xi32> to vector<8x1xi32>
    %167 = vector.broadcast %166 : vector<8x1xi32> to vector<8x128xi32>
    %168 = arith.cmpi eq, %167, %43 : vector<8x128xi32>
    %169 = arith.extui %168 : vector<8x128xi1> to vector<8x128xi32>
    %170 = arith.sitofp %169 : vector<8x128xi32> to vector<8x128xf32>
    %171 = arith.truncf %170 : vector<8x128xf32> to vector<8x128xbf16>
    %cst_54 = arith.constant dense<0.000000e+00> : vector<8x160xf32>
    %172 = tpu.matmul %171, %44, %cst_54 {dimension_numbers = #tpu.dot_dimension_numbers<[1], [0], [0], [1], [0, 0, 1, 1], [], []>} : vector<8x128xbf16>, vector<128x160xbf16>, vector<8x160xf32> -> vector<8x160xf32>
    %173 = arith.truncf %172 : vector<8x160xf32> to vector<8x160xbf16>
    %c11 = arith.constant 11 : index
    %c0_55 = arith.constant 0 : index
    %c0_56 = arith.constant 0 : index
    %174 = vector.load %arg10[%c11, %c0_55, %c0_56] : memref<16x8x160xbf16, #tpu.memory_space<vmem>>, vector<1x8x160xbf16>
    %175 = vector.shape_cast %174 : vector<1x8x160xbf16> to vector<8x160xbf16>
    %176 = vector.shape_cast %173 : vector<8x160xbf16> to vector<1x8x160xbf16>
    tpu.vector_store %arg10[%c11, %c0_55, %c0_56], %176 {strides = array<i32>} : memref<16x8x160xbf16, #tpu.memory_space<vmem>>, vector<1x8x160xbf16>,
    %177 = vector.extract_strided_slice %42 {offsets = [0, 12], sizes = [8, 1], strides = [1, 1]} : vector<8x16xi32> to vector<8x1xi32>
    %178 = vector.broadcast %177 : vector<8x1xi32> to vector<8x128xi32>
    %179 = arith.cmpi eq, %178, %43 : vector<8x128xi32>
    %180 = arith.extui %179 : vector<8x128xi1> to vector<8x128xi32>
    %181 = arith.sitofp %180 : vector<8x128xi32> to vector<8x128xf32>
    %182 = arith.truncf %181 : vector<8x128xf32> to vector<8x128xbf16>
    %cst_57 = arith.constant dense<0.000000e+00> : vector<8x160xf32>
    %183 = tpu.matmul %182, %44, %cst_57 {dimension_numbers = #tpu.dot_dimension_numbers<[1], [0], [0], [1], [0, 0, 1, 1], [], []>} : vector<8x128xbf16>, vector<128x160xbf16>, vector<8x160xf32> -> vector<8x160xf32>
    %184 = arith.truncf %183 : vector<8x160xf32> to vector<8x160xbf16>
    %c12 = arith.constant 12 : index
    %c0_58 = arith.constant 0 : index
    %c0_59 = arith.constant 0 : index
    %185 = vector.load %arg10[%c12, %c0_58, %c0_59] : memref<16x8x160xbf16, #tpu.memory_space<vmem>>, vector<1x8x160xbf16>
    %186 = vector.shape_cast %185 : vector<1x8x160xbf16> to vector<8x160xbf16>
    %187 = vector.shape_cast %184 : vector<8x160xbf16> to vector<1x8x160xbf16>
    tpu.vector_store %arg10[%c12, %c0_58, %c0_59], %187 {strides = array<i32>} : memref<16x8x160xbf16, #tpu.memory_space<vmem>>, vector<1x8x160xbf16>,
    %188 = vector.extract_strided_slice %42 {offsets = [0, 13], sizes = [8, 1], strides = [1, 1]} : vector<8x16xi32> to vector<8x1xi32>
    %189 = vector.broadcast %188 : vector<8x1xi32> to vector<8x128xi32>
    %190 = arith.cmpi eq, %189, %43 : vector<8x128xi32>
    %191 = arith.extui %190 : vector<8x128xi1> to vector<8x128xi32>
    %192 = arith.sitofp %191 : vector<8x128xi32> to vector<8x128xf32>
    %193 = arith.truncf %192 : vector<8x128xf32> to vector<8x128xbf16>
    %cst_60 = arith.constant dense<0.000000e+00> : vector<8x160xf32>
    %194 = tpu.matmul %193, %44, %cst_60 {dimension_numbers = #tpu.dot_dimension_numbers<[1], [0], [0], [1], [0, 0, 1, 1], [], []>} : vector<8x128xbf16>, vector<128x160xbf16>, vector<8x160xf32> -> vector<8x160xf32>
    %195 = arith.truncf %194 : vector<8x160xf32> to vector<8x160xbf16>
    %c13 = arith.constant 13 : index
    %c0_61 = arith.constant 0 : index
    %c0_62 = arith.constant 0 : index
    %196 = vector.load %arg10[%c13, %c0_61, %c0_62] : memref<16x8x160xbf16, #tpu.memory_space<vmem>>, vector<1x8x160xbf16>
    %197 = vector.shape_cast %196 : vector<1x8x160xbf16> to vector<8x160xbf16>
    %198 = vector.shape_cast %195 : vector<8x160xbf16> to vector<1x8x160xbf16>
    tpu.vector_store %arg10[%c13, %c0_61, %c0_62], %198 {strides = array<i32>} : memref<16x8x160xbf16, #tpu.memory_space<vmem>>, vector<1x8x160xbf16>,
    %199 = vector.extract_strided_slice %42 {offsets = [0, 14], sizes = [8, 1], strides = [1, 1]} : vector<8x16xi32> to vector<8x1xi32>
    %200 = vector.broadcast %199 : vector<8x1xi32> to vector<8x128xi32>
    %201 = arith.cmpi eq, %200, %43 : vector<8x128xi32>
    %202 = arith.extui %201 : vector<8x128xi1> to vector<8x128xi32>
    %203 = arith.sitofp %202 : vector<8x128xi32> to vector<8x128xf32>
    %204 = arith.truncf %203 : vector<8x128xf32> to vector<8x128xbf16>
    %cst_63 = arith.constant dense<0.000000e+00> : vector<8x160xf32>
    %205 = tpu.matmul %204, %44, %cst_63 {dimension_numbers = #tpu.dot_dimension_numbers<[1], [0], [0], [1], [0, 0, 1, 1], [], []>} : vector<8x128xbf16>, vector<128x160xbf16>, vector<8x160xf32> -> vector<8x160xf32>
    %206 = arith.truncf %205 : vector<8x160xf32> to vector<8x160xbf16>
    %c14 = arith.constant 14 : index
    %c0_64 = arith.constant 0 : index
    %c0_65 = arith.constant 0 : index
    %207 = vector.load %arg10[%c14, %c0_64, %c0_65] : memref<16x8x160xbf16, #tpu.memory_space<vmem>>, vector<1x8x160xbf16>
    %208 = vector.shape_cast %207 : vector<1x8x160xbf16> to vector<8x160xbf16>
    %209 = vector.shape_cast %206 : vector<8x160xbf16> to vector<1x8x160xbf16>
    tpu.vector_store %arg10[%c14, %c0_64, %c0_65], %209 {strides = array<i32>} : memref<16x8x160xbf16, #tpu.memory_space<vmem>>, vector<1x8x160xbf16>,
    %210 = vector.extract_strided_slice %42 {offsets = [0, 15], sizes = [8, 1], strides = [1, 1]} : vector<8x16xi32> to vector<8x1xi32>
    %211 = vector.broadcast %210 : vector<8x1xi32> to vector<8x128xi32>
    %212 = arith.cmpi eq, %211, %43 : vector<8x128xi32>
    %213 = arith.extui %212 : vector<8x128xi1> to vector<8x128xi32>
    %214 = arith.sitofp %213 : vector<8x128xi32> to vector<8x128xf32>
    %215 = arith.truncf %214 : vector<8x128xf32> to vector<8x128xbf16>
    %cst_66 = arith.constant dense<0.000000e+00> : vector<8x160xf32>
    %216 = tpu.matmul %215, %44, %cst_66 {dimension_numbers = #tpu.dot_dimension_numbers<[1], [0], [0], [1], [0, 0, 1, 1], [], []>} : vector<8x128xbf16>, vector<128x160xbf16>, vector<8x160xf32> -> vector<8x160xf32>
    %217 = arith.truncf %216 : vector<8x160xf32> to vector<8x160xbf16>
    %c15 = arith.constant 15 : index
    %c0_67 = arith.constant 0 : index
    %c0_68 = arith.constant 0 : index
    %218 = vector.load %arg10[%c15, %c0_67, %c0_68] : memref<16x8x160xbf16, #tpu.memory_space<vmem>>, vector<1x8x160xbf16>
    %219 = vector.shape_cast %218 : vector<1x8x160xbf16> to vector<8x160xbf16>
    %220 = vector.shape_cast %217 : vector<8x160xbf16> to vector<1x8x160xbf16>
    tpu.vector_store %arg10[%c15, %c0_67, %c0_68], %220 {strides = array<i32>} : memref<16x8x160xbf16, #tpu.memory_space<vmem>>, vector<1x8x160xbf16>,
    %c0_69 = arith.constant 0 : index
    %c0_70 = arith.constant 0 : index
    %c0_71 = arith.constant 0 : index
    %221 = vector.load %arg10[%c0_69, %c0_70, %c0_71] : memref<16x8x160xbf16, #tpu.memory_space<vmem>>, vector<1x8x32xbf16>
    %222 = vector.shape_cast %221 : vector<1x8x32xbf16> to vector<8x32xbf16>
    %223 = arith.extf %222 : vector<8x32xbf16> to vector<8x32xf32>
    %c1_72 = arith.constant 1 : index
    %c0_73 = arith.constant 0 : index
    %c32 = arith.constant 32 : index
    %224 = vector.load %arg10[%c1_72, %c0_73, %c32] : memref<16x8x160xbf16, #tpu.memory_space<vmem>>, vector<1x8x32xbf16>
    %225 = vector.shape_cast %224 : vector<1x8x32xbf16> to vector<8x32xbf16>
    %226 = arith.extf %225 : vector<8x32xbf16> to vector<8x32xf32>
    %227 = arith.addf %223, %226 : vector<8x32xf32>
    %c2_74 = arith.constant 2 : index
    %c0_75 = arith.constant 0 : index
    %c64 = arith.constant 64 : index
    %228 = vector.load %arg10[%c2_74, %c0_75, %c64] : memref<16x8x160xbf16, #tpu.memory_space<vmem>>, vector<1x8x32xbf16>
    %229 = vector.shape_cast %228 : vector<1x8x32xbf16> to vector<8x32xbf16>
    %230 = arith.extf %229 : vector<8x32xbf16> to vector<8x32xf32>
    %231 = arith.addf %227, %230 : vector<8x32xf32>
    %c3_76 = arith.constant 3 : index
    %c0_77 = arith.constant 0 : index
    %c96 = arith.constant 96 : index
    %232 = vector.load %arg10[%c3_76, %c0_77, %c96] : memref<16x8x160xbf16, #tpu.memory_space<vmem>>, vector<1x8x32xbf16>
    %233 = vector.shape_cast %232 : vector<1x8x32xbf16> to vector<8x32xbf16>
    %234 = arith.extf %233 : vector<8x32xbf16> to vector<8x32xf32>
    %235 = arith.addf %231, %234 : vector<8x32xf32>
    %c4_78 = arith.constant 4 : index
    %c0_79 = arith.constant 0 : index
    %c128 = arith.constant 128 : index
    %236 = vector.load %arg10[%c4_78, %c0_79, %c128] : memref<16x8x160xbf16, #tpu.memory_space<vmem>>, vector<1x8x32xbf16>
    %237 = vector.shape_cast %236 : vector<1x8x32xbf16> to vector<8x32xbf16>
    %238 = arith.extf %237 : vector<8x32xbf16> to vector<8x32xf32>
    %239 = arith.addf %235, %238 : vector<8x32xf32>
    %c1_80 = arith.constant 1 : index
    %c0_81 = arith.constant 0 : index
    %c0_82 = arith.constant 0 : index
    %240 = vector.load %arg10[%c1_80, %c0_81, %c0_82] : memref<16x8x160xbf16, #tpu.memory_space<vmem>>, vector<1x8x32xbf16>
    %241 = vector.shape_cast %240 : vector<1x8x32xbf16> to vector<8x32xbf16>
    %242 = arith.extf %241 : vector<8x32xbf16> to vector<8x32xf32>
    %c2_83 = arith.constant 2 : index
    %c0_84 = arith.constant 0 : index
    %c32_85 = arith.constant 32 : index
    %243 = vector.load %arg10[%c2_83, %c0_84, %c32_85] : memref<16x8x160xbf16, #tpu.memory_space<vmem>>, vector<1x8x32xbf16>
    %244 = vector.shape_cast %243 : vector<1x8x32xbf16> to vector<8x32xbf16>
    %245 = arith.extf %244 : vector<8x32xbf16> to vector<8x32xf32>
    %246 = arith.addf %242, %245 : vector<8x32xf32>
    %c3_86 = arith.constant 3 : index
    %c0_87 = arith.constant 0 : index
    %c64_88 = arith.constant 64 : index
    %247 = vector.load %arg10[%c3_86, %c0_87, %c64_88] : memref<16x8x160xbf16, #tpu.memory_space<vmem>>, vector<1x8x32xbf16>
    %248 = vector.shape_cast %247 : vector<1x8x32xbf16> to vector<8x32xbf16>
    %249 = arith.extf %248 : vector<8x32xbf16> to vector<8x32xf32>
    %250 = arith.addf %246, %249 : vector<8x32xf32>
    %c4_89 = arith.constant 4 : index
    %c0_90 = arith.constant 0 : index
    %c96_91 = arith.constant 96 : index
    %251 = vector.load %arg10[%c4_89, %c0_90, %c96_91] : memref<16x8x160xbf16, #tpu.memory_space<vmem>>, vector<1x8x32xbf16>
    %252 = vector.shape_cast %251 : vector<1x8x32xbf16> to vector<8x32xbf16>
    %253 = arith.extf %252 : vector<8x32xbf16> to vector<8x32xf32>
    %254 = arith.addf %250, %253 : vector<8x32xf32>
    %c5_92 = arith.constant 5 : index
    %c0_93 = arith.constant 0 : index
    %c128_94 = arith.constant 128 : index
    %255 = vector.load %arg10[%c5_92, %c0_93, %c128_94] : memref<16x8x160xbf16, #tpu.memory_space<vmem>>, vector<1x8x32xbf16>
    %256 = vector.shape_cast %255 : vector<1x8x32xbf16> to vector<8x32xbf16>
    %257 = arith.extf %256 : vector<8x32xbf16> to vector<8x32xf32>
    %258 = arith.addf %254, %257 : vector<8x32xf32>
    %259 = arith.maximumf %239, %258 : vector<8x32xf32>
    %c2_95 = arith.constant 2 : index
    %c0_96 = arith.constant 0 : index
    %c0_97 = arith.constant 0 : index
    %260 = vector.load %arg10[%c2_95, %c0_96, %c0_97] : memref<16x8x160xbf16, #tpu.memory_space<vmem>>, vector<1x8x32xbf16>
    %261 = vector.shape_cast %260 : vector<1x8x32xbf16> to vector<8x32xbf16>
    %262 = arith.extf %261 : vector<8x32xbf16> to vector<8x32xf32>
    %c3_98 = arith.constant 3 : index
    %c0_99 = arith.constant 0 : index
    %c32_100 = arith.constant 32 : index
    %263 = vector.load %arg10[%c3_98, %c0_99, %c32_100] : memref<16x8x160xbf16, #tpu.memory_space<vmem>>, vector<1x8x32xbf16>
    %264 = vector.shape_cast %263 : vector<1x8x32xbf16> to vector<8x32xbf16>
    %265 = arith.extf %264 : vector<8x32xbf16> to vector<8x32xf32>
    %266 = arith.addf %262, %265 : vector<8x32xf32>
    %c4_101 = arith.constant 4 : index
    %c0_102 = arith.constant 0 : index
    %c64_103 = arith.constant 64 : index
    %267 = vector.load %arg10[%c4_101, %c0_102, %c64_103] : memref<16x8x160xbf16, #tpu.memory_space<vmem>>, vector<1x8x32xbf16>
    %268 = vector.shape_cast %267 : vector<1x8x32xbf16> to vector<8x32xbf16>
    %269 = arith.extf %268 : vector<8x32xbf16> to vector<8x32xf32>
    %270 = arith.addf %266, %269 : vector<8x32xf32>
    %c5_104 = arith.constant 5 : index
    %c0_105 = arith.constant 0 : index
    %c96_106 = arith.constant 96 : index
    %271 = vector.load %arg10[%c5_104, %c0_105, %c96_106] : memref<16x8x160xbf16, #tpu.memory_space<vmem>>, vector<1x8x32xbf16>
    %272 = vector.shape_cast %271 : vector<1x8x32xbf16> to vector<8x32xbf16>
    %273 = arith.extf %272 : vector<8x32xbf16> to vector<8x32xf32>
    %274 = arith.addf %270, %273 : vector<8x32xf32>
    %c6_107 = arith.constant 6 : index
    %c0_108 = arith.constant 0 : index
    %c128_109 = arith.constant 128 : index
    %275 = vector.load %arg10[%c6_107, %c0_108, %c128_109] : memref<16x8x160xbf16, #tpu.memory_space<vmem>>, vector<1x8x32xbf16>
    %276 = vector.shape_cast %275 : vector<1x8x32xbf16> to vector<8x32xbf16>
    %277 = arith.extf %276 : vector<8x32xbf16> to vector<8x32xf32>
    %278 = arith.addf %274, %277 : vector<8x32xf32>
    %279 = arith.maximumf %259, %278 : vector<8x32xf32>
    %c3_110 = arith.constant 3 : index
    %c0_111 = arith.constant 0 : index
    %c0_112 = arith.constant 0 : index
    %280 = vector.load %arg10[%c3_110, %c0_111, %c0_112] : memref<16x8x160xbf16, #tpu.memory_space<vmem>>, vector<1x8x32xbf16>
    %281 = vector.shape_cast %280 : vector<1x8x32xbf16> to vector<8x32xbf16>
    %282 = arith.extf %281 : vector<8x32xbf16> to vector<8x32xf32>
    %c4_113 = arith.constant 4 : index
    %c0_114 = arith.constant 0 : index
    %c32_115 = arith.constant 32 : index
    %283 = vector.load %arg10[%c4_113, %c0_114, %c32_115] : memref<16x8x160xbf16, #tpu.memory_space<vmem>>, vector<1x8x32xbf16>
    %284 = vector.shape_cast %283 : vector<1x8x32xbf16> to vector<8x32xbf16>
    %285 = arith.extf %284 : vector<8x32xbf16> to vector<8x32xf32>
    %286 = arith.addf %282, %285 : vector<8x32xf32>
    %c5_116 = arith.constant 5 : index
    %c0_117 = arith.constant 0 : index
    %c64_118 = arith.constant 64 : index
    %287 = vector.load %arg10[%c5_116, %c0_117, %c64_118] : memref<16x8x160xbf16, #tpu.memory_space<vmem>>, vector<1x8x32xbf16>
    %288 = vector.shape_cast %287 : vector<1x8x32xbf16> to vector<8x32xbf16>
    %289 = arith.extf %288 : vector<8x32xbf16> to vector<8x32xf32>
    %290 = arith.addf %286, %289 : vector<8x32xf32>
    %c6_119 = arith.constant 6 : index
    %c0_120 = arith.constant 0 : index
    %c96_121 = arith.constant 96 : index
    %291 = vector.load %arg10[%c6_119, %c0_120, %c96_121] : memref<16x8x160xbf16, #tpu.memory_space<vmem>>, vector<1x8x32xbf16>
    %292 = vector.shape_cast %291 : vector<1x8x32xbf16> to vector<8x32xbf16>
    %293 = arith.extf %292 : vector<8x32xbf16> to vector<8x32xf32>
    %294 = arith.addf %290, %293 : vector<8x32xf32>
    %c7_122 = arith.constant 7 : index
    %c0_123 = arith.constant 0 : index
    %c128_124 = arith.constant 128 : index
    %295 = vector.load %arg10[%c7_122, %c0_123, %c128_124] : memref<16x8x160xbf16, #tpu.memory_space<vmem>>, vector<1x8x32xbf16>
    %296 = vector.shape_cast %295 : vector<1x8x32xbf16> to vector<8x32xbf16>
    %297 = arith.extf %296 : vector<8x32xbf16> to vector<8x32xf32>
    %298 = arith.addf %294, %297 : vector<8x32xf32>
    %299 = arith.maximumf %279, %298 : vector<8x32xf32>
    %c4_125 = arith.constant 4 : index
    %c0_126 = arith.constant 0 : index
    %c0_127 = arith.constant 0 : index
    %300 = vector.load %arg10[%c4_125, %c0_126, %c0_127] : memref<16x8x160xbf16, #tpu.memory_space<vmem>>, vector<1x8x32xbf16>
    %301 = vector.shape_cast %300 : vector<1x8x32xbf16> to vector<8x32xbf16>
    %302 = arith.extf %301 : vector<8x32xbf16> to vector<8x32xf32>
    %c5_128 = arith.constant 5 : index
    %c0_129 = arith.constant 0 : index
    %c32_130 = arith.constant 32 : index
    %303 = vector.load %arg10[%c5_128, %c0_129, %c32_130] : memref<16x8x160xbf16, #tpu.memory_space<vmem>>, vector<1x8x32xbf16>
    %304 = vector.shape_cast %303 : vector<1x8x32xbf16> to vector<8x32xbf16>
    %305 = arith.extf %304 : vector<8x32xbf16> to vector<8x32xf32>
    %306 = arith.addf %302, %305 : vector<8x32xf32>
    %c6_131 = arith.constant 6 : index
    %c0_132 = arith.constant 0 : index
    %c64_133 = arith.constant 64 : index
    %307 = vector.load %arg10[%c6_131, %c0_132, %c64_133] : memref<16x8x160xbf16, #tpu.memory_space<vmem>>, vector<1x8x32xbf16>
    %308 = vector.shape_cast %307 : vector<1x8x32xbf16> to vector<8x32xbf16>
    %309 = arith.extf %308 : vector<8x32xbf16> to vector<8x32xf32>
    %310 = arith.addf %306, %309 : vector<8x32xf32>
    %c7_134 = arith.constant 7 : index
    %c0_135 = arith.constant 0 : index
    %c96_136 = arith.constant 96 : index
    %311 = vector.load %arg10[%c7_134, %c0_135, %c96_136] : memref<16x8x160xbf16, #tpu.memory_space<vmem>>, vector<1x8x32xbf16>
    %312 = vector.shape_cast %311 : vector<1x8x32xbf16> to vector<8x32xbf16>
    %313 = arith.extf %312 : vector<8x32xbf16> to vector<8x32xf32>
    %314 = arith.addf %310, %313 : vector<8x32xf32>
    %c8_137 = arith.constant 8 : index
    %c0_138 = arith.constant 0 : index
    %c128_139 = arith.constant 128 : index
    %315 = vector.load %arg10[%c8_137, %c0_138, %c128_139] : memref<16x8x160xbf16, #tpu.memory_space<vmem>>, vector<1x8x32xbf16>
    %316 = vector.shape_cast %315 : vector<1x8x32xbf16> to vector<8x32xbf16>
    %317 = arith.extf %316 : vector<8x32xbf16> to vector<8x32xf32>
    %318 = arith.addf %314, %317 : vector<8x32xf32>
    %319 = arith.maximumf %299, %318 : vector<8x32xf32>
    %c5_140 = arith.constant 5 : index
    %c0_141 = arith.constant 0 : index
    %c0_142 = arith.constant 0 : index
    %320 = vector.load %arg10[%c5_140, %c0_141, %c0_142] : memref<16x8x160xbf16, #tpu.memory_space<vmem>>, vector<1x8x32xbf16>
    %321 = vector.shape_cast %320 : vector<1x8x32xbf16> to vector<8x32xbf16>
    %322 = arith.extf %321 : vector<8x32xbf16> to vector<8x32xf32>
    %c6_143 = arith.constant 6 : index
    %c0_144 = arith.constant 0 : index
    %c32_145 = arith.constant 32 : index
    %323 = vector.load %arg10[%c6_143, %c0_144, %c32_145] : memref<16x8x160xbf16, #tpu.memory_space<vmem>>, vector<1x8x32xbf16>
    %324 = vector.shape_cast %323 : vector<1x8x32xbf16> to vector<8x32xbf16>
    %325 = arith.extf %324 : vector<8x32xbf16> to vector<8x32xf32>
    %326 = arith.addf %322, %325 : vector<8x32xf32>
    %c7_146 = arith.constant 7 : index
    %c0_147 = arith.constant 0 : index
    %c64_148 = arith.constant 64 : index
    %327 = vector.load %arg10[%c7_146, %c0_147, %c64_148] : memref<16x8x160xbf16, #tpu.memory_space<vmem>>, vector<1x8x32xbf16>
    %328 = vector.shape_cast %327 : vector<1x8x32xbf16> to vector<8x32xbf16>
    %329 = arith.extf %328 : vector<8x32xbf16> to vector<8x32xf32>
    %330 = arith.addf %326, %329 : vector<8x32xf32>
    %c8_149 = arith.constant 8 : index
    %c0_150 = arith.constant 0 : index
    %c96_151 = arith.constant 96 : index
    %331 = vector.load %arg10[%c8_149, %c0_150, %c96_151] : memref<16x8x160xbf16, #tpu.memory_space<vmem>>, vector<1x8x32xbf16>
    %332 = vector.shape_cast %331 : vector<1x8x32xbf16> to vector<8x32xbf16>
    %333 = arith.extf %332 : vector<8x32xbf16> to vector<8x32xf32>
    %334 = arith.addf %330, %333 : vector<8x32xf32>
    %c9_152 = arith.constant 9 : index
    %c0_153 = arith.constant 0 : index
    %c128_154 = arith.constant 128 : index
    %335 = vector.load %arg10[%c9_152, %c0_153, %c128_154] : memref<16x8x160xbf16, #tpu.memory_space<vmem>>, vector<1x8x32xbf16>
    %336 = vector.shape_cast %335 : vector<1x8x32xbf16> to vector<8x32xbf16>
    %337 = arith.extf %336 : vector<8x32xbf16> to vector<8x32xf32>
    %338 = arith.addf %334, %337 : vector<8x32xf32>
    %339 = arith.maximumf %319, %338 : vector<8x32xf32>
    %c6_155 = arith.constant 6 : index
    %c0_156 = arith.constant 0 : index
    %c0_157 = arith.constant 0 : index
    %340 = vector.load %arg10[%c6_155, %c0_156, %c0_157] : memref<16x8x160xbf16, #tpu.memory_space<vmem>>, vector<1x8x32xbf16>
    %341 = vector.shape_cast %340 : vector<1x8x32xbf16> to vector<8x32xbf16>
    %342 = arith.extf %341 : vector<8x32xbf16> to vector<8x32xf32>
    %c7_158 = arith.constant 7 : index
    %c0_159 = arith.constant 0 : index
    %c32_160 = arith.constant 32 : index
    %343 = vector.load %arg10[%c7_158, %c0_159, %c32_160] : memref<16x8x160xbf16, #tpu.memory_space<vmem>>, vector<1x8x32xbf16>
    %344 = vector.shape_cast %343 : vector<1x8x32xbf16> to vector<8x32xbf16>
    %345 = arith.extf %344 : vector<8x32xbf16> to vector<8x32xf32>
    %346 = arith.addf %342, %345 : vector<8x32xf32>
    %c8_161 = arith.constant 8 : index
    %c0_162 = arith.constant 0 : index
    %c64_163 = arith.constant 64 : index
    %347 = vector.load %arg10[%c8_161, %c0_162, %c64_163] : memref<16x8x160xbf16, #tpu.memory_space<vmem>>, vector<1x8x32xbf16>
    %348 = vector.shape_cast %347 : vector<1x8x32xbf16> to vector<8x32xbf16>
    %349 = arith.extf %348 : vector<8x32xbf16> to vector<8x32xf32>
    %350 = arith.addf %346, %349 : vector<8x32xf32>
    %c9_164 = arith.constant 9 : index
    %c0_165 = arith.constant 0 : index
    %c96_166 = arith.constant 96 : index
    %351 = vector.load %arg10[%c9_164, %c0_165, %c96_166] : memref<16x8x160xbf16, #tpu.memory_space<vmem>>, vector<1x8x32xbf16>
    %352 = vector.shape_cast %351 : vector<1x8x32xbf16> to vector<8x32xbf16>
    %353 = arith.extf %352 : vector<8x32xbf16> to vector<8x32xf32>
    %354 = arith.addf %350, %353 : vector<8x32xf32>
    %c10_167 = arith.constant 10 : index
    %c0_168 = arith.constant 0 : index
    %c128_169 = arith.constant 128 : index
    %355 = vector.load %arg10[%c10_167, %c0_168, %c128_169] : memref<16x8x160xbf16, #tpu.memory_space<vmem>>, vector<1x8x32xbf16>
    %356 = vector.shape_cast %355 : vector<1x8x32xbf16> to vector<8x32xbf16>
    %357 = arith.extf %356 : vector<8x32xbf16> to vector<8x32xf32>
    %358 = arith.addf %354, %357 : vector<8x32xf32>
    %359 = arith.maximumf %339, %358 : vector<8x32xf32>
    %c7_170 = arith.constant 7 : index
    %c0_171 = arith.constant 0 : index
    %c0_172 = arith.constant 0 : index
    %360 = vector.load %arg10[%c7_170, %c0_171, %c0_172] : memref<16x8x160xbf16, #tpu.memory_space<vmem>>, vector<1x8x32xbf16>
    %361 = vector.shape_cast %360 : vector<1x8x32xbf16> to vector<8x32xbf16>
    %362 = arith.extf %361 : vector<8x32xbf16> to vector<8x32xf32>
    %c8_173 = arith.constant 8 : index
    %c0_174 = arith.constant 0 : index
    %c32_175 = arith.constant 32 : index
    %363 = vector.load %arg10[%c8_173, %c0_174, %c32_175] : memref<16x8x160xbf16, #tpu.memory_space<vmem>>, vector<1x8x32xbf16>
    %364 = vector.shape_cast %363 : vector<1x8x32xbf16> to vector<8x32xbf16>
    %365 = arith.extf %364 : vector<8x32xbf16> to vector<8x32xf32>
    %366 = arith.addf %362, %365 : vector<8x32xf32>
    %c9_176 = arith.constant 9 : index
    %c0_177 = arith.constant 0 : index
    %c64_178 = arith.constant 64 : index
    %367 = vector.load %arg10[%c9_176, %c0_177, %c64_178] : memref<16x8x160xbf16, #tpu.memory_space<vmem>>, vector<1x8x32xbf16>
    %368 = vector.shape_cast %367 : vector<1x8x32xbf16> to vector<8x32xbf16>
    %369 = arith.extf %368 : vector<8x32xbf16> to vector<8x32xf32>
    %370 = arith.addf %366, %369 : vector<8x32xf32>
    %c10_179 = arith.constant 10 : index
    %c0_180 = arith.constant 0 : index
    %c96_181 = arith.constant 96 : index
    %371 = vector.load %arg10[%c10_179, %c0_180, %c96_181] : memref<16x8x160xbf16, #tpu.memory_space<vmem>>, vector<1x8x32xbf16>
    %372 = vector.shape_cast %371 : vector<1x8x32xbf16> to vector<8x32xbf16>
    %373 = arith.extf %372 : vector<8x32xbf16> to vector<8x32xf32>
    %374 = arith.addf %370, %373 : vector<8x32xf32>
    %c11_182 = arith.constant 11 : index
    %c0_183 = arith.constant 0 : index
    %c128_184 = arith.constant 128 : index
    %375 = vector.load %arg10[%c11_182, %c0_183, %c128_184] : memref<16x8x160xbf16, #tpu.memory_space<vmem>>, vector<1x8x32xbf16>
    %376 = vector.shape_cast %375 : vector<1x8x32xbf16> to vector<8x32xbf16>
    %377 = arith.extf %376 : vector<8x32xbf16> to vector<8x32xf32>
    %378 = arith.addf %374, %377 : vector<8x32xf32>
    %379 = arith.maximumf %359, %378 : vector<8x32xf32>
    %c8_185 = arith.constant 8 : index
    %c0_186 = arith.constant 0 : index
    %c0_187 = arith.constant 0 : index
    %380 = vector.load %arg10[%c8_185, %c0_186, %c0_187] : memref<16x8x160xbf16, #tpu.memory_space<vmem>>, vector<1x8x32xbf16>
    %381 = vector.shape_cast %380 : vector<1x8x32xbf16> to vector<8x32xbf16>
    %382 = arith.extf %381 : vector<8x32xbf16> to vector<8x32xf32>
    %c9_188 = arith.constant 9 : index
    %c0_189 = arith.constant 0 : index
    %c32_190 = arith.constant 32 : index
    %383 = vector.load %arg10[%c9_188, %c0_189, %c32_190] : memref<16x8x160xbf16, #tpu.memory_space<vmem>>, vector<1x8x32xbf16>
    %384 = vector.shape_cast %383 : vector<1x8x32xbf16> to vector<8x32xbf16>
    %385 = arith.extf %384 : vector<8x32xbf16> to vector<8x32xf32>
    %386 = arith.addf %382, %385 : vector<8x32xf32>
    %c10_191 = arith.constant 10 : index
    %c0_192 = arith.constant 0 : index
    %c64_193 = arith.constant 64 : index
    %387 = vector.load %arg10[%c10_191, %c0_192, %c64_193] : memref<16x8x160xbf16, #tpu.memory_space<vmem>>, vector<1x8x32xbf16>
    %388 = vector.shape_cast %387 : vector<1x8x32xbf16> to vector<8x32xbf16>
    %389 = arith.extf %388 : vector<8x32xbf16> to vector<8x32xf32>
    %390 = arith.addf %386, %389 : vector<8x32xf32>
    %c11_194 = arith.constant 11 : index
    %c0_195 = arith.constant 0 : index
    %c96_196 = arith.constant 96 : index
    %391 = vector.load %arg10[%c11_194, %c0_195, %c96_196] : memref<16x8x160xbf16, #tpu.memory_space<vmem>>, vector<1x8x32xbf16>
    %392 = vector.shape_cast %391 : vector<1x8x32xbf16> to vector<8x32xbf16>
    %393 = arith.extf %392 : vector<8x32xbf16> to vector<8x32xf32>
    %394 = arith.addf %390, %393 : vector<8x32xf32>
    %c12_197 = arith.constant 12 : index
    %c0_198 = arith.constant 0 : index
    %c128_199 = arith.constant 128 : index
    %395 = vector.load %arg10[%c12_197, %c0_198, %c128_199] : memref<16x8x160xbf16, #tpu.memory_space<vmem>>, vector<1x8x32xbf16>
    %396 = vector.shape_cast %395 : vector<1x8x32xbf16> to vector<8x32xbf16>
    %397 = arith.extf %396 : vector<8x32xbf16> to vector<8x32xf32>
    %398 = arith.addf %394, %397 : vector<8x32xf32>
    %399 = arith.maximumf %379, %398 : vector<8x32xf32>
    %c9_200 = arith.constant 9 : index
    %c0_201 = arith.constant 0 : index
    %c0_202 = arith.constant 0 : index
    %400 = vector.load %arg10[%c9_200, %c0_201, %c0_202] : memref<16x8x160xbf16, #tpu.memory_space<vmem>>, vector<1x8x32xbf16>
    %401 = vector.shape_cast %400 : vector<1x8x32xbf16> to vector<8x32xbf16>
    %402 = arith.extf %401 : vector<8x32xbf16> to vector<8x32xf32>
    %c10_203 = arith.constant 10 : index
    %c0_204 = arith.constant 0 : index
    %c32_205 = arith.constant 32 : index
    %403 = vector.load %arg10[%c10_203, %c0_204, %c32_205] : memref<16x8x160xbf16, #tpu.memory_space<vmem>>, vector<1x8x32xbf16>
    %404 = vector.shape_cast %403 : vector<1x8x32xbf16> to vector<8x32xbf16>
    %405 = arith.extf %404 : vector<8x32xbf16> to vector<8x32xf32>
    %406 = arith.addf %402, %405 : vector<8x32xf32>
    %c11_206 = arith.constant 11 : index
    %c0_207 = arith.constant 0 : index
    %c64_208 = arith.constant 64 : index
    %407 = vector.load %arg10[%c11_206, %c0_207, %c64_208] : memref<16x8x160xbf16, #tpu.memory_space<vmem>>, vector<1x8x32xbf16>
    %408 = vector.shape_cast %407 : vector<1x8x32xbf16> to vector<8x32xbf16>
    %409 = arith.extf %408 : vector<8x32xbf16> to vector<8x32xf32>
    %410 = arith.addf %406, %409 : vector<8x32xf32>
    %c12_209 = arith.constant 12 : index
    %c0_210 = arith.constant 0 : index
    %c96_211 = arith.constant 96 : index
    %411 = vector.load %arg10[%c12_209, %c0_210, %c96_211] : memref<16x8x160xbf16, #tpu.memory_space<vmem>>, vector<1x8x32xbf16>
    %412 = vector.shape_cast %411 : vector<1x8x32xbf16> to vector<8x32xbf16>
    %413 = arith.extf %412 : vector<8x32xbf16> to vector<8x32xf32>
    %414 = arith.addf %410, %413 : vector<8x32xf32>
    %c13_212 = arith.constant 13 : index
    %c0_213 = arith.constant 0 : index
    %c128_214 = arith.constant 128 : index
    %415 = vector.load %arg10[%c13_212, %c0_213, %c128_214] : memref<16x8x160xbf16, #tpu.memory_space<vmem>>, vector<1x8x32xbf16>
    %416 = vector.shape_cast %415 : vector<1x8x32xbf16> to vector<8x32xbf16>
    %417 = arith.extf %416 : vector<8x32xbf16> to vector<8x32xf32>
    %418 = arith.addf %414, %417 : vector<8x32xf32>
    %419 = arith.maximumf %399, %418 : vector<8x32xf32>
    %c10_215 = arith.constant 10 : index
    %c0_216 = arith.constant 0 : index
    %c0_217 = arith.constant 0 : index
    %420 = vector.load %arg10[%c10_215, %c0_216, %c0_217] : memref<16x8x160xbf16, #tpu.memory_space<vmem>>, vector<1x8x32xbf16>
    %421 = vector.shape_cast %420 : vector<1x8x32xbf16> to vector<8x32xbf16>
    %422 = arith.extf %421 : vector<8x32xbf16> to vector<8x32xf32>
    %c11_218 = arith.constant 11 : index
    %c0_219 = arith.constant 0 : index
    %c32_220 = arith.constant 32 : index
    %423 = vector.load %arg10[%c11_218, %c0_219, %c32_220] : memref<16x8x160xbf16, #tpu.memory_space<vmem>>, vector<1x8x32xbf16>
    %424 = vector.shape_cast %423 : vector<1x8x32xbf16> to vector<8x32xbf16>
    %425 = arith.extf %424 : vector<8x32xbf16> to vector<8x32xf32>
    %426 = arith.addf %422, %425 : vector<8x32xf32>
    %c12_221 = arith.constant 12 : index
    %c0_222 = arith.constant 0 : index
    %c64_223 = arith.constant 64 : index
    %427 = vector.load %arg10[%c12_221, %c0_222, %c64_223] : memref<16x8x160xbf16, #tpu.memory_space<vmem>>, vector<1x8x32xbf16>
    %428 = vector.shape_cast %427 : vector<1x8x32xbf16> to vector<8x32xbf16>
    %429 = arith.extf %428 : vector<8x32xbf16> to vector<8x32xf32>
    %430 = arith.addf %426, %429 : vector<8x32xf32>
    %c13_224 = arith.constant 13 : index
    %c0_225 = arith.constant 0 : index
    %c96_226 = arith.constant 96 : index
    %431 = vector.load %arg10[%c13_224, %c0_225, %c96_226] : memref<16x8x160xbf16, #tpu.memory_space<vmem>>, vector<1x8x32xbf16>
    %432 = vector.shape_cast %431 : vector<1x8x32xbf16> to vector<8x32xbf16>
    %433 = arith.extf %432 : vector<8x32xbf16> to vector<8x32xf32>
    %434 = arith.addf %430, %433 : vector<8x32xf32>
    %c14_227 = arith.constant 14 : index
    %c0_228 = arith.constant 0 : index
    %c128_229 = arith.constant 128 : index
    %435 = vector.load %arg10[%c14_227, %c0_228, %c128_229] : memref<16x8x160xbf16, #tpu.memory_space<vmem>>, vector<1x8x32xbf16>
    %436 = vector.shape_cast %435 : vector<1x8x32xbf16> to vector<8x32xbf16>
    %437 = arith.extf %436 : vector<8x32xbf16> to vector<8x32xf32>
    %438 = arith.addf %434, %437 : vector<8x32xf32>
    %439 = arith.maximumf %419, %438 : vector<8x32xf32>
    %c11_230 = arith.constant 11 : index
    %c0_231 = arith.constant 0 : index
    %c0_232 = arith.constant 0 : index
    %440 = vector.load %arg10[%c11_230, %c0_231, %c0_232] : memref<16x8x160xbf16, #tpu.memory_space<vmem>>, vector<1x8x32xbf16>
    %441 = vector.shape_cast %440 : vector<1x8x32xbf16> to vector<8x32xbf16>
    %442 = arith.extf %441 : vector<8x32xbf16> to vector<8x32xf32>
    %c12_233 = arith.constant 12 : index
    %c0_234 = arith.constant 0 : index
    %c32_235 = arith.constant 32 : index
    %443 = vector.load %arg10[%c12_233, %c0_234, %c32_235] : memref<16x8x160xbf16, #tpu.memory_space<vmem>>, vector<1x8x32xbf16>
    %444 = vector.shape_cast %443 : vector<1x8x32xbf16> to vector<8x32xbf16>
    %445 = arith.extf %444 : vector<8x32xbf16> to vector<8x32xf32>
    %446 = arith.addf %442, %445 : vector<8x32xf32>
    %c13_236 = arith.constant 13 : index
    %c0_237 = arith.constant 0 : index
    %c64_238 = arith.constant 64 : index
    %447 = vector.load %arg10[%c13_236, %c0_237, %c64_238] : memref<16x8x160xbf16, #tpu.memory_space<vmem>>, vector<1x8x32xbf16>
    %448 = vector.shape_cast %447 : vector<1x8x32xbf16> to vector<8x32xbf16>
    %449 = arith.extf %448 : vector<8x32xbf16> to vector<8x32xf32>
    %450 = arith.addf %446, %449 : vector<8x32xf32>
    %c14_239 = arith.constant 14 : index
    %c0_240 = arith.constant 0 : index
    %c96_241 = arith.constant 96 : index
    %451 = vector.load %arg10[%c14_239, %c0_240, %c96_241] : memref<16x8x160xbf16, #tpu.memory_space<vmem>>, vector<1x8x32xbf16>
    %452 = vector.shape_cast %451 : vector<1x8x32xbf16> to vector<8x32xbf16>
    %453 = arith.extf %452 : vector<8x32xbf16> to vector<8x32xf32>
    %454 = arith.addf %450, %453 : vector<8x32xf32>
    %c15_242 = arith.constant 15 : index
    %c0_243 = arith.constant 0 : index
    %c128_244 = arith.constant 128 : index
    %455 = vector.load %arg10[%c15_242, %c0_243, %c128_244] : memref<16x8x160xbf16, #tpu.memory_space<vmem>>, vector<1x8x32xbf16>
    %456 = vector.shape_cast %455 : vector<1x8x32xbf16> to vector<8x32xbf16>
    %457 = arith.extf %456 : vector<8x32xbf16> to vector<8x32xf32>
    %458 = arith.addf %454, %457 : vector<8x32xf32>
    %459 = arith.maximumf %439, %458 : vector<8x32xf32>
    %c0_245 = arith.constant 0 : index
    %c0_246 = arith.constant 0 : index
    %460 = vector.load %arg8[%c0_245, %c0_246] : memref<1x32xf32, #tpu.memory_space<vmem>>, vector<1x32xf32>
    %461 = vector.broadcast %460 : vector<1x32xf32> to vector<8x32xf32>
    %462 = arith.addf %459, %461 : vector<8x32xf32>
    %cst_247 = arith.constant 0.000000e+00 : f32
    %463 = vector.broadcast %cst_247 : f32 to vector<8x32xf32>
    %464 = arith.maximumf %462, %463 : vector<8x32xf32>
    %465 = tpu.concatenate %41, %464 in 1 : vector<8x32xf32>, vector<8x32xf32> -> vector<8x64xf32>
    %c0_248 = arith.constant 0 : index
    %c0_249 = arith.constant 0 : index
    %466 = vector.load %arg9[%c0_248, %c0_249] : memref<8x64xf32, #tpu.memory_space<vmem>>, vector<8x64xf32>
    tpu.vector_store %arg9[%c0_248, %c0_249], %465 {strides = array<i32>} : memref<8x64xf32, #tpu.memory_space<vmem>>, vector<8x64xf32>,
    return
  }
  func.func @transform_0(%arg0: i32) -> (i32, i32) {
    %c0_i32 = arith.constant 0 : i32
    %c0_i32_0 = arith.constant 0 : i32
    return %arg0, %c0_i32 : i32, i32
  }
  func.func @transform_1(%arg0: i32) -> (i32, i32) {
    %c0_i32 = arith.constant 0 : i32
    %c0_i32_0 = arith.constant 0 : i32
    return %arg0, %c0_i32 : i32, i32
  }
  func.func @transform_2(%arg0: i32) -> (i32, i32) {
    %c0_i32 = arith.constant 0 : i32
    %c0_i32_0 = arith.constant 0 : i32
    %c0_i32_1 = arith.constant 0 : i32
    return %c0_i32, %c0_i32_0 : i32, i32
  }
  func.func @transform_3(%arg0: i32) -> (i32, i32) {
    %c0_i32 = arith.constant 0 : i32
    %c0_i32_0 = arith.constant 0 : i32
    %c0_i32_1 = arith.constant 0 : i32
    return %c0_i32, %c0_i32_0 : i32, i32
  }
  func.func @transform_4(%arg0: i32) -> (i32, i32) {
    %c0_i32 = arith.constant 0 : i32
    %c0_i32_0 = arith.constant 0 : i32
    %c0_i32_1 = arith.constant 0 : i32
    return %c0_i32, %c0_i32_0 : i32, i32
  }
  func.func @transform_5(%arg0: i32) -> (i32, i32) {
    %c0_i32 = arith.constant 0 : i32
    %c0_i32_0 = arith.constant 0 : i32
    %c0_i32_1 = arith.constant 0 : i32
    return %c0_i32, %c0_i32_0 : i32, i32
  }
  func.func @transform_6(%arg0: i32) -> (i32, i32) {
    %c0_i32 = arith.constant 0 : i32
    %c0_i32_0 = arith.constant 0 : i32
    %c0_i32_1 = arith.constant 0 : i32
    return %c0_i32, %c0_i32_0 : i32, i32
  }
  func.func @transform_7(%arg0: i32) -> (i32, i32) {
    %c0_i32 = arith.constant 0 : i32
    %c0_i32_0 = arith.constant 0 : i32
    %c0_i32_1 = arith.constant 0 : i32
    return %c0_i32, %c0_i32_0 : i32, i32
  }
  func.func @transform_8(%arg0: i32) -> (i32, i32) {
    %c0_i32 = arith.constant 0 : i32
    %c0_i32_0 = arith.constant 0 : i32
    return %arg0, %c0_i32 : i32, i32
  }
}

</mosaic_0001>

<bundles_post_ra>
// kernel: tpu_custom_call.1
= control target key start
LH: loop header
LB: loop body
LE: loop exit
PB: predicated region body
PF: predicated region fallthrough
CT: control target
= control target key end

     0   :  { %13 = vsyncpa [#allocation4], 0  ;;  %s2770_s0 = inlined_call_operand.vmem [shape: bf16[16,32], index: 0, kind: input, shape index: {}]   ;;  %s2771_s1 = inlined_call_operand.vmem [shape: s32[16,16], index: 1, kind: input, shape index: {}]   ;;  %s2772_s2 = inlined_call_operand.vmem [shape: bf16[128,160], index: 2, kind: input, shape index: {}]   ;;  %s2773_s3 = inlined_call_operand.vmem [shape: bf16[32,64], index: 3, kind: input, shape index: {}]   ;;  %s2774_s4 = inlined_call_operand.vmem [shape: f32[1,64], index: 4, kind: input, shape index: {}]   ;;  %s2775_s5 = inlined_call_operand.vmem [shape: bf16[32,64], index: 5, kind: input, shape index: {}]   ;;  %s2776_s6 = inlined_call_operand.vmem [shape: f32[1,64], index: 6, kind: input, shape index: {}]   ;;  %s2777_s7 = inlined_call_operand.vmem [shape: f32[1,32], index: 7, kind: input, shape index: {}]   ;;  %s2778_s8 = inlined_call_operand.hbm [shape: f32[16,64], index: 8, kind: output, shape index: {}]  }
   0x1   :  { %15 = vsyncpa [#allocation4 + $0x1], 0  ;;  %s1964_s27 = smov 0   ;;  %s1966_s28 = smov 0  }
   0x2   :  { %s1968_s29 = smov 0   ;;  %s1970_s30 = smov 0  }
   0x3 LB: > { %s1985_s9 = sadd.s32 4294967295, %s1897_s30   ;;  %s1463_s10 = sadd.s32 4294967294, %s1897_s30   ;;  %s1897_s30 = sphi %s1970_s30, %s2800_s30   ;;  %s1893_s29 = sphi %s1968_s29, %s2799_s29   ;;  %s1889_s28 = sphi %s1966_s28, %s2798_s28   ;;  %s1885_s27 = sphi %s1964_s27, %s2797_s27  }
   0x4   : > { %s1989_s11 = sadd.s32 1, %s1897_s30   ;;  %s206_s12 = sadd.s32 1, %s1893_s29 }
   0x5   : > { %s203_s13 = ssub.s32 %s1897_s30, %s1989_s11  ;;  %p216_p0 = scmp.ne.s32.totalorder %s1893_s29, %s1889_s28 }
   0x6   : > { %p204_p1 = scmp.eq.s32.totalorder %s203_s13, 0  ;;  %p217_p2 = scmp.eq.s32.totalorder %s1985_s9, 1 }
   0x7   : > { %p222_p3 = scmp.ne.s32.totalorder %s1889_s28, %s1885_s27  ;;  %p223_p4 = scmp.eq.s32.totalorder %s1463_s10, 1 }
   0x8   : > { %s2000_s14 = scalar_select %p204_p1, %s1893_s29, %s206_s12  }
   0x9   : > { %p2002_p5 = por %p217_p2, %p216_p0  ;;  %p2006_p6 = por %p223_p4, %p222_p3 }
   0xa   : > { %p1466_p7 = scmp.ge.s32.totalorder %s1897_s30, 1  ;;  %p273_p8 = scmp.lt.s32.totalorder %s1897_s30, 3 }
   0xc   : > { %p274_p9 = pnand %p1466_p7, %p273_p8 }
   0xd   : > { %p310_p10 = scmp.lt.s32.totalorder (!%p274_p9), %s1985_s9, 1  ;;  %s1906_s10 = smov (!%p274_p9), 96  }
   0xe   : > { %277 = sbr.rel (%p274_p9) target bundleno = 869 (0x365), region = 52  ;;  %s1917_s23 = smov (!%p274_p9), 64  }
   0xf   : > { %s1918_s24 = smov (!%p274_p9), 32   ;;  %s1635_s18 = sshll.u32 (!%p274_p9), %s1985_s9, 3 }
  0x13   : > { %v1639_v0 = vld [vmem:[%s2773_s3 + $0x8] sm:$0xff]  ;;  %v1638_v1 = vld [vmem:[%s2773_s3] sm:$0xff]  ;;  %s311_s21 = scalar_select %p310_p10, %s1985_s9, 1  ;;  %vm341_vm0 = vcmask 261120   ;;  %v1899_v3 = vmov 0   ;;  %v1900_v6 = vmov 2  }
  0x14   : > { %351 = vmatpush.bf16.msra.mxu0 %v1639_v0  ;;  %1717 = vset.pattern.permute.xlu0 %v1899_v3  ;;  %v1549_v5 = vld [vmem:[%s2772_s2 + $0x70] sm:$0xf]  ;;  %v1901_v7 = vmov 4   ;;  %v1657_v8 = vld [vmem:[%s2772_s2 + $0x74] sm:$0xf0]  ;;  %v1641_v15 = vld [vmem:[%s2775_s5 + $0x8] sm:$0xff] }
  0x15   : > { %s1468_s22 = sshll.u32 %s311_s21, 2  ;;  %s1469_s26 = sshll.u32 %s311_s21, 3  ;;  %1718 = vset.pattern.permute.xlu1 %v1900_v6  ;;  %1720 = vset.pattern.permute.xlu2 %v1901_v7  ;;  %v1656_v9 = vld [vmem:[%s2772_s2 + $0x74] sm:$0xf]  ;;  %v1551_v10 = vld [vmem:[%s2772_s2 + $0x78] sm:$0xf0]  ;;  %v2046_v11 = vor.u32 %v1657_v8, %v1549_v5 }
  0x16   : > { %s313_s25 = scalar_lea.vmem %s2770_s0, %s1468_s22  ;;  %s317_s13 = scalar_lea.vmem %s2771_s1, %s1469_s26  ;;  %v2048_v12 = vor.u32 %v1656_v9, %v1551_v10  ;;  %v1541_v13 = vld [vmem:[%s2772_s2 + $0x60] sm:$0xf]  ;;  %v1655_v14 = vld [vmem:[%s2772_s2 + $0x64] sm:$0xf0]  ;;  %v1654_v16 = vld [vmem:[%s2772_s2 + $0x64] sm:$0xf]  ;;  %416 = vmatpush.bf16.msra.mxu1 %v1641_v15 }
  0x17   : > { %v2023_v2 = vld [vmem:[%s313_s25] sm:$0xf]  ;;  %v1543_v17 = vld [vmem:[%s2772_s2 + $0x68] sm:$0xf0]  ;;  %557 = vmatpush.bf16.msra.mxu2 %v2046_v11  ;;  %v2067_v18 = vor.u32 %v1655_v14, %v1541_v13  ;;  %v1533_v20 = vld [vmem:[%s2772_s2 + $0x50] sm:$0xf]  ;;  %s1387_s21 = scalar_lea.hbm %s2778_s8, %s1635_s18 }
  0x18   : > { %352 = vmatpush.bf16.msra.mxu0 %v1638_v1  ;;  %v2030_v4 = vld [vmem:[%s317_s13] sm:$0xff]  ;;  %570 = vmatpush.bf16.msra.mxu3 %v2048_v12  ;;  %v2069_v19 = vor.u32 %v1654_v16, %v1543_v17  ;;  %v1653_v21 = vld [vmem:[%s2772_s2 + $0x54] sm:$0xf0]  ;;  %v1652_v22 = vld [vmem:[%s2772_s2 + $0x54] sm:$0xf]  ;;  %v1902_v31 = vmov 1  }
  0x19   : > { %625 = vperm.xlu1 %1718, %v2030_v4   ;;  %697 = vperm.xlu2 %1720, %v2030_v4   ;;  %v1535_v23 = vld [vmem:[%s2772_s2 + $0x58] sm:$0xf0]  ;;  %v2086_v24 = vor.u32 %v1653_v21, %v1533_v20  ;;  %v1525_v26 = vld [vmem:[%s2772_s2 + $0x40] sm:$0xf]  ;;  %v1651_v27 = vld [vmem:[%s2772_s2 + $0x44] sm:$0xf0]  ;;  %v320_v21 = vunpack.c.l.bf16 %v2023_v2 }
  0x1a   : > { %v2088_v25 = vor.u32 %v1652_v22, %v1535_v23  ;;  %v1650_v28 = vld [vmem:[%s2772_s2 + $0x44] sm:$0xf]  ;;  %v1527_v29 = vld [vmem:[%s2772_s2 + $0x48] sm:$0xf0]  ;;  %v1903_v32 = vmov 3   ;;  %v2110_v33 = vor.u32 %v1651_v27, %v1525_v26  ;;  %v1904_v48 = vmov 6  }
  0x1b   : > { %1478 = vmatmul.msk.bf16.vlgmr.msra.gmra.mxu0 %vm341_vm0, %v2023_v2  ;;  %558 = vmatpush.bf16.msra.mxu2 %v2067_v18  ;;  %v1640_v30 = vld [vmem:[%s2775_s5] sm:$0xff]  ;;  %v2112_v34 = vor.u32 %v1650_v28, %v1527_v29  ;;  %v1517_v35 = vld [vmem:[%s2772_s2 + $0x30] sm:$0xf]  ;;  %v1649_v36 = vld [vmem:[%s2772_s2 + $0x34] sm:$0xf0]  ;;  %v1905_v49 = vmov 5   ;;  %v452_v29 = vlaneseq }
  0x1c   : > { %595 = vmatpush.bf16.msrb.mxu0 %v2046_v11  ;;  %571 = vmatpush.bf16.msra.mxu3 %v2069_v19  ;;  %v1648_v37 = vld [vmem:[%s2772_s2 + $0x34] sm:$0xf]  ;;  %v1519_v38 = vld [vmem:[%s2772_s2 + $0x38] sm:$0xf0]  ;;  %v1824_v39 = vld [vmem:[%s2774_s4] ss:$0 sm:$0xff]  ;;  %v2133_v40 = vor.u32 %v1649_v36, %v1517_v35 }
  0x1d   : > { %417 = vmatpush.bf16.msra.mxu1 %v1640_v30  ;;  %v2135_v41 = vor.u32 %v1648_v37, %v1519_v38  ;;  %v1509_v42 = vld [vmem:[%s2772_s2 + $0x20] sm:$0xf]  ;;  %v1647_v43 = vld [vmem:[%s2772_s2 + $0x24] sm:$0xf0]  ;;  %v1646_v45 = vld [vmem:[%s2772_s2 + $0x24] sm:$0xf] }
  0x1e   : > { %v1511_v46 = vld [vmem:[%s2772_s2 + $0x28] sm:$0xf0]  ;;  %v2153_v50 = vor.u32 %v1647_v43, %v1509_v42  ;;  %v1501_v51 = vld [vmem:[%s2772_s2 + $0x10] sm:$0xf]  ;;  %v1645_v55 = vld [vmem:[%s2772_s2 + $0x14] sm:$0xf0] }
  0x1f   : > { %559 = vmatpush.bf16.msra.mxu2 %v2086_v24  ;;  %v2159_v54 = vor.u32 %v1646_v45, %v1511_v46  ;;  %v1644_v56 = vld [vmem:[%s2772_s2 + $0x14] sm:$0xf]  ;;  %v1503_v57 = vld [vmem:[%s2772_s2 + $0x18] sm:$0xf0]  ;;  %v2175_v58 = vor.u32 %v1645_v55, %v1501_v51  ;;  %v1493_v60 = vld [vmem:[%s2772_s2] sm:$0xf] }
  0x20   : > { %596 = vmatpush.bf16.msrb.mxu0 %v2067_v18  ;;  %572 = vmatpush.bf16.msra.mxu3 %v2088_v25  ;;  %v2178_v59 = vor.u32 %v1644_v56, %v1503_v57  ;;  %v1643_v61 = vld [vmem:[%s2772_s2 + $0x4] sm:$0xf0]  ;;  %v1642_v63 = vld [vmem:[%s2772_s2 + $0x4] sm:$0xf]  ;;  %v1495_v0 = vld [vmem:[%s2772_s2 + $0x8] sm:$0xf0] }
  0x21   : > { %1719 = vset.pattern.permute.xlu1 %v1902_v31  ;;  %1721 = vset.pattern.permute.xlu2 %v1903_v32  ;;  %v1907_v1 = vmov 7   ;;  %v2195_v3 = vor.u32 %v1643_v61, %v1493_v60  ;;  %v2199_v6 = vor.u32 %v1642_v63, %v1495_v0  ;;  %v1908_v9 = vmov 8   ;;  %s307_s13 = sand.u32 1, %s1889_s28  }
  0x22   : > { %589 = vperm.xlu1 %1719, %v2030_v4   ;;  %661 = vperm.xlu2 %1721, %v2030_v4   ;;  %v1909_v2 = vmov 9   ;;  %v2237_v30 = vand.u32 127, %v452_v29  ;;  %v1910_v35 = vmov 1.0|1.0   ;;  %v1912_v45 = vmov 11   ;;  %s1467_s17 = sshll.u32 %s307_s13, 3 }
  0x23   : > { %608 = vmatpush.bf16.msrb.mxu1 %v2048_v12  ;;  %560 = vmatpush.bf16.msra.mxu2 %v2110_v33  ;;  %v1915_v55 = vmov 13   ;;  %s309_s22 = scalar_lea.vmem [#allocation3], %s1467_s17  ;;  %s1377_s9 = scalar_lea.sflag [#allocation4], %s307_s13 }
  0x24   : > { %597 = vmatpush.bf16.msrb.mxu0 %v2086_v24  ;;  %573 = vmatpush.bf16.msra.mxu3 %v2112_v34  ;;  %s1855_s17 = scalar_lea.hbm %s2778_s8, 16 }
  0x27   : > { %609 = vmatpush.bf16.msrb.mxu1 %v2069_v19  ;;  %561 = vmatpush.bf16.msra.mxu2 %v2133_v40 }
  0x28   : > { %598 = vmatpush.bf16.msrb.mxu0 %v2110_v33  ;;  %574 = vmatpush.bf16.msra.mxu3 %v2135_v41 }
  0x2a   : > { %1722 = vset.pattern.permute.xlu1 %v1904_v48  ;;  %1723 = vset.pattern.permute.xlu2 %v1905_v49  ;;  %v1913_v49 = vmov 12  }
  0x2b   : > { %769 = vperm.xlu1 %1722, %v2030_v4   ;;  %733 = vperm.xlu2 %1723, %v2030_v4  }
  0x2c   : > { %610 = vmatpush.bf16.msrb.mxu1 %v2088_v25  ;;  %599 = vmatpush.bf16.msrb.mxu0 %v2133_v40 }
  0x2d   : > { %562 = vmatpush.bf16.msra.mxu2 %v2153_v50  ;;  %575 = vmatpush.bf16.msra.mxu3 %v2159_v54 }
  0x30   : > { %611 = vmatpush.bf16.msrb.mxu1 %v2112_v34  ;;  %600 = vmatpush.bf16.msrb.mxu0 %v2153_v50 }
  0x31   : > { %563 = vmatpush.bf16.msra.mxu2 %v2175_v58  ;;  %576 = vmatpush.bf16.msra.mxu3 %v2178_v59 }
  0x33   : > { %1725 = vset.pattern.permute.xlu1 %v1907_v1 }
  0x34   : > { %805 = vperm.xlu1 %1725, %v2030_v4   ;;  %612 = vmatpush.bf16.msrb.mxu1 %v2135_v41 }
  0x35   : > { %601 = vmatpush.bf16.msrb.mxu0 %v2175_v58  ;;  %564 = vmatpush.bf16.msra.mxu2 %v2195_v3 }
  0x36   : > { %577 = vmatpush.bf16.msra.mxu3 %v2199_v6 }
  0x38   : > { %613 = vmatpush.bf16.msrb.mxu1 %v2159_v54 }
  0x39   : > { %631 = vmatpush.bf16.msrb.mxu2 %v2046_v11  ;;  %602 = vmatpush.bf16.msrb.mxu0 %v2195_v3 }
  0x3a   : > { %644 = vmatpush.bf16.msrb.mxu3 %v2048_v12 }
  0x3c   : > { %614 = vmatpush.bf16.msrb.mxu1 %v2178_v59  ;;  %1727 = vset.pattern.permute.xlu1 %v1909_v2 }
  0x3d   : > { %667 = vmatpush.bf16.msra.mxu0 %v2046_v11  ;;  %632 = vmatpush.bf16.msrb.mxu2 %v2067_v18 }
  0x3e   : > { %645 = vmatpush.bf16.msrb.mxu3 %v2069_v19  ;;  %877 = vperm.xlu1 %1727, %v2030_v4  }
  0x40   : > { %615 = vmatpush.bf16.msrb.mxu1 %v2199_v6 }
  0x41   : > { %668 = vmatpush.bf16.msra.mxu0 %v2067_v18  ;;  %633 = vmatpush.bf16.msrb.mxu2 %v2086_v24 }
  0x42   : > { %646 = vmatpush.bf16.msrb.mxu3 %v2088_v25 }
  0x45   : > { %669 = vmatpush.bf16.msra.mxu0 %v2086_v24  ;;  %634 = vmatpush.bf16.msrb.mxu2 %v2110_v33 }
  0x46   : > { %647 = vmatpush.bf16.msrb.mxu3 %v2112_v34 }
  0x49   : > { %670 = vmatpush.bf16.msra.mxu0 %v2110_v33  ;;  %635 = vmatpush.bf16.msrb.mxu2 %v2133_v40 }
  0x4a   : > { %648 = vmatpush.bf16.msrb.mxu3 %v2135_v41 }
  0x4d   : > { %671 = vmatpush.bf16.msra.mxu0 %v2133_v40  ;;  %636 = vmatpush.bf16.msrb.mxu2 %v2153_v50 }
  0x4e   : > { %649 = vmatpush.bf16.msrb.mxu3 %v2159_v54 }
  0x51   : > { %672 = vmatpush.bf16.msra.mxu0 %v2153_v50  ;;  %637 = vmatpush.bf16.msrb.mxu2 %v2175_v58 }
  0x52   : > { %650 = vmatpush.bf16.msrb.mxu3 %v2178_v59 }
  0x55   : > { %673 = vmatpush.bf16.msra.mxu0 %v2175_v58  ;;  %638 = vmatpush.bf16.msrb.mxu2 %v2195_v3 }
  0x56   : > { %651 = vmatpush.bf16.msrb.mxu3 %v2199_v6 }
  0x59   : > { %674 = vmatpush.bf16.msra.mxu0 %v2195_v3 }
  0x73   : > { %v2248_v36 = vpop.permute.xlu2 %697 }
  0x74   : > { %vm699_vm15 = vcmp.eq.s32.totalorder %v2248_v36, %v2237_v30 }
  0x8b   : > { %v626_v28 = vpop.permute.xlu1 %625 }
  0x8c   : > { %vm627_vm11 = vcmp.eq.s32.totalorder %v626_v28, %v2237_v30 }
  0x8d   : > { %vm1565_vm12 = vmpackc.low %vm627_vm11, %vm627_vm11 }
  0x94   : > { %v590_v31 = vpop.permute.xlu1 %589 }
  0x95   : > { %vm591_vm5 = vcmp.eq.s32.totalorder %v590_v31, %v2237_v30 }
  0x96   : > { %vm2240_vm6 = vmpackc.low %vm591_vm5, %vm591_vm5 }
  0x97   : > { %1561 = vmatmul.msk.bf16.vlgmr.msrb.gmra.mxu0 %vm2240_vm6, %v1910_v35 }
  0x98   : > { %v354_v44 = vpop.f32.mrf.mxu0  ;;  %739 = vmatpush.bf16.msrb.mxu0 %v2046_v11 }
  0x99   : > { %v355_v47 = vadd.f32 %v1824_v39, %v354_v44  ;;  %v1911_v39 = vmov 10   ;;  %v662_v44 = vpop.permute.xlu2 %661 }
  0x9a   : > { %1726 = vset.pattern.permute.xlu2 %v1911_v39  ;;  %vm663_vm7 = vcmp.eq.s32.totalorder %v662_v44, %v2237_v30 }
  0x9b   : > { %v1479_v52 = vmul.f32 -1.442695, %v355_v47  ;;  %v377_v53 = vmax.f32 %v355_v47, 0.0  ;;  %913 = vperm.xlu2 %1726, %v2030_v4   ;;  %vm2260_vm8 = vmpackc.low %vm663_vm7, %vm663_vm7 }
  0x9c   : > { %740 = vmatpush.bf16.msrb.mxu0 %v2067_v18 }
  0x9d   : > { %1827 = vpow2.f32 %v1479_v52  ;;  %379 = vrot.lane.b32.xlu0 %v377_v53, %s1906_s10  ;;  %v1914_v52 = vmov 14   ;;  %v770_v53 = vpop.permute.xlu1 %769 }
  0x9e   : > { %1730 = vset.pattern.permute.xlu1 %v1914_v52 }
  0x9f   : > { %1057 = vperm.xlu1 %1730, %v2030_v4  }
  0xa0   : > { %v356_v62 = vpop.f32.mrf.mxu0  ;;  %741 = vmatpush.bf16.msrb.mxu0 %v2086_v24 }
  0xa1   : > { %v734_v48 = vpop.permute.xlu2 %733 }
  0xa2   : > { %vm735_vm13 = vcmp.eq.s32.totalorder %v734_v48, %v2237_v30 }
  0xa3   : > { %v1828_v5 = vpop.eup %1827  ;;  %1728 = vset.pattern.permute.xlu2 %v1913_v49  ;;  %vm2303_vm14 = vmpackc.low %vm735_vm13, %vm735_vm13 }
  0xa4   : > { %v361_v7 = vadd.f32 1.0, %v1828_v5  ;;  %742 = vmatpush.bf16.msrb.mxu0 %v2110_v33  ;;  %985 = vperm.xlu2 %1728, %v2030_v4  }
  0xa5   : > { %471 = vperm.xlu0 %1717, %v2030_v4  }
  0xa6   : > { %1829 = vrcp.f32 %v361_v7  ;;  %v373_v14 = vand.u32 2147483648, %v361_v7  ;;  %v371_v16 = vand.u32 2147483647, %v361_v7  ;;  %vm367_vm2 = vweird.f32 %v361_v7  ;;  %v806_v56 = vpop.permute.xlu1 %805 }
  0xa7   : > { %1571 = vmatmul.msk.bf16.vlgmr.msra.gmra.mxu0 %vm2260_vm8, %v1910_v35 }
  0xa8   : > { %v374_v20 = vor.u32 1.1754944e-38, %v373_v14  ;;  %vm372_vm4 = vcmp.eq.f32.partialorder %v371_v16, 8.507059e+37  ;;  %743 = vmatpush.bf16.msrb.mxu0 %v2133_v40 }
  0xac   : > { %v1830_v8 = vpop.eup %1829  ;;  %744 = vmatpush.bf16.msrb.mxu0 %v2153_v50  ;;  %1731 = vset.pattern.permute.xlu2 %v1915_v55 }
  0xad   : > { %1724 = vset.pattern.permute.xlu0 %v1908_v9  ;;  %v363_v10 = vmul.f32 %v1830_v8, %v361_v7  ;;  %vm368_vm1 = vweird.f32 %v1830_v8  ;;  %1021 = vperm.xlu2 %1731, %v2030_v4  }
  0xae   : > { %841 = vperm.xlu0 %1724, %v2030_v4   ;;  %vm369_vm3 = vmor %vm367_vm2, %vm368_vm1  ;;  %vm807_vm2 = vcmp.eq.s32.totalorder %v806_v56, %v2237_v30 }
  0xaf   : > { %v364_v13 = vsub.f32 1.0, %v363_v10  ;;  %vm1575_vm1 = vmpackc.low %vm699_vm15, %vm699_vm15  ;;  %vm585_vm15 = vcmask 261124  }
  0xb0   : > { %745 = vmatpush.bf16.msrb.mxu0 %v2175_v58  ;;  %v878_v60 = vpop.permute.xlu1 %877 }
  0xb1   : > { %v365_v15 = vmul.f32 %v1830_v8, %v364_v13 }
  0xb3   : > { %v366_v17 = vadd.f32 %v1830_v8, %v365_v15 }
  0xb4   : > { %746 = vmatpush.bf16.msrb.mxu0 %v2195_v3 }
  0xb5   : > { %v370_v22 = vsel %vm369_vm3, %v1830_v8, %v366_v17  ;;  %vm2353_vm3 = vmpackc.low %vm807_vm2, %vm807_vm2 }
  0xb6   : > { %v375_v23 = vsel %vm372_vm4, %v374_v20, %v370_v22  ;;  %1729 = vset.pattern.permute.xlu0 %v1912_v45  ;;  %vm771_vm4 = vcmp.eq.s32.totalorder %v770_v53, %v2237_v30 }
  0xb7   : > { %v383_v26 = vsub.f32 1.0, %v375_v23  ;;  %949 = vperm.xlu0 %1729, %v2030_v4   ;;  %1581 = vmatmul.msk.bf16.vlgmr.msrb.gmra.mxu0 %vm2303_vm14, %v1910_v35  ;;  %vm1585_vm5 = vmpackc.low %vm771_vm4, %vm771_vm4 }
  0xb8   : > { %811 = vmatpush.bf16.msra.mxu0 %v2046_v11 }
  0xb9   : > { %v384_v27 = vmul.f32 %v383_v26, %v320_v21  ;;  %v1916_v26 = vmov 15  }
  0xba   : > { %1732 = vset.pattern.permute.xlu1 %v1916_v26 }
  0xbb   : > { %1093 = vperm.xlu1 %1732, %v2030_v4  }
  0xbc   : > { %812 = vmatpush.bf16.msra.mxu0 %v2067_v18 }
  0xbf   : > { %1823 = vset.pattern.permute.xlu0 %v1916_v26 }
  0xc0   : > { %813 = vmatpush.bf16.msra.mxu0 %v2086_v24 }
  0xc4   : > { %814 = vmatpush.bf16.msra.mxu0 %v2110_v33 }
  0xc8   : > { %815 = vmatpush.bf16.msra.mxu0 %v2133_v40 }
  0xcc   : > { %816 = vmatpush.bf16.msra.mxu0 %v2153_v50 }
  0xd0   : > { %817 = vmatpush.bf16.msra.mxu0 %v2175_v58 }
  0xd4   : > { %818 = vmatpush.bf16.msra.mxu0 %v2195_v3 }
  0xd7   : > { %1591 = vmatmul.msk.bf16.vlgmr.msra.gmra.mxu0 %vm2353_vm3, %v1910_v35 }
  0xd8   : > { %883 = vmatpush.bf16.msrb.mxu0 %v2046_v11 }
  0xdc   : > { %884 = vmatpush.bf16.msrb.mxu0 %v2067_v18 }
  0xe0   : > { %885 = vmatpush.bf16.msrb.mxu0 %v2086_v24 }
  0xe4   : > { %886 = vmatpush.bf16.msrb.mxu0 %v2110_v33 }
  0xe8   : > { %887 = vmatpush.bf16.msrb.mxu0 %v2133_v40 }
  0xec   : > { %888 = vmatpush.bf16.msrb.mxu0 %v2153_v50 }
  0xf0   : > { %889 = vmatpush.bf16.msrb.mxu0 %v2175_v58 }
  0xf4   : > { %890 = vmatpush.bf16.msrb.mxu0 %v2195_v3 }
  0xf5   : > { %v914_v0 = vpop.permute.xlu2 %913 }
  0xf8   : > { %955 = vmatpush.bf16.msra.mxu0 %v2046_v11 }
  0xfc   : > { %956 = vmatpush.bf16.msra.mxu0 %v2067_v18 }
  0xfe   : > { %v986_v13 = vpop.permute.xlu2 %985 }
  0xff   : > { %vm987_vm4 = vcmp.eq.s32.totalorder %v986_v13, %v2237_v30 }
 0x100   : > { %957 = vmatpush.bf16.msra.mxu0 %v2086_v24 }
 0x104   : > { %958 = vmatpush.bf16.msra.mxu0 %v2110_v33 }
 0x108   : > { %959 = vmatpush.bf16.msra.mxu0 %v2133_v40 }
 0x10c   : > { %960 = vmatpush.bf16.msra.mxu0 %v2153_v50 }
 0x10f   : > { %v380_v37 = vpop.permute.xlu0 %379 }
 0x110   : > { %v382_v38 = vmul.f32 %v380_v37, %v375_v23  ;;  %961 = vmatpush.bf16.msra.mxu0 %v2175_v58  ;;  %v1022_v23 = vpop.permute.xlu2 %1021 }
 0x111   : > { %vm1023_vm2 = vcmp.eq.s32.totalorder %v1022_v23, %v2237_v30  ;;  %v1058_v55 = vpop.permute.xlu1 %1057 }
 0x112   : > { %v2252_v42 = vadd.f32 %v384_v27, %v382_v38 }
 0x114   : > { %v386_v43 = vpack.c.bf16 %v2252_v42, %v2252_v42  ;;  %962 = vmatpush.bf16.msra.mxu0 %v2195_v3  ;;  %v2440_v63 = vpop.f32.mrf.mxu0 }
 0x116   : > { %1488 = vmatmul.msk.bf16.vlgmr.msra.gmra.mxu1 %vm341_vm0, %v386_v43 }
 0x117   : > { %680 = vmatpush.bf16.msra.mxu1 %v2048_v12  ;;  %v472_v47 = vpop.permute.xlu0 %471 }
 0x118   : > { %vm473_vm9 = vcmp.eq.s32.totalorder %v472_v47, %v2237_v30 }
 0x119   : > { %vm1555_vm10 = vmpackc.low %vm473_vm9, %vm473_vm9 }
 0x11a   : > { %1556 = vmatmul.msk.bf16.vlgmr.msra.gmra.mxu2 %vm1555_vm10, %v1910_v35  ;;  %1558 = vmatmul.msk.bf16.vlgmr.msra.gmra.mxu3 %vm1555_vm10, %v1910_v35 }
 0x11b   : > { %681 = vmatpush.bf16.msra.mxu1 %v2069_v19  ;;  %703 = vmatpush.bf16.msra.mxu2 %v2046_v11 }
 0x11c   : > { %716 = vmatpush.bf16.msra.mxu3 %v2048_v12  ;;  %v606_v7 = vpop.f32.mrf.mxu0 }
 0x11f   : > { %682 = vmatpush.bf16.msra.mxu1 %v2088_v25  ;;  %704 = vmatpush.bf16.msra.mxu2 %v2067_v18 }
 0x120   : > { %717 = vmatpush.bf16.msra.mxu3 %v2069_v19  ;;  %v842_v62 = vpop.permute.xlu0 %841 }
 0x123   : > { %683 = vmatpush.bf16.msra.mxu1 %v2112_v34  ;;  %705 = vmatpush.bf16.msra.mxu2 %v2086_v24 }
 0x124   : > { %718 = vmatpush.bf16.msra.mxu3 %v2088_v25  ;;  %v2477_v9 = vpop.f32.mrf.mxu0 }
 0x126   : > { %1563 = vmatmul.msk.bf16.vlgmr.msrb.gmra.mxu1 %vm2240_vm6, %v1910_v35  ;;  %vm879_vm6 = vcmp.eq.s32.totalorder %v878_v60, %v2237_v30 }
 0x127   : > { %684 = vmatpush.bf16.msra.mxu1 %v2135_v41  ;;  %706 = vmatpush.bf16.msra.mxu2 %v2110_v33  ;;  %vm2398_vm7 = vmpackc.low %vm879_vm6, %vm879_vm6  ;;  %vm1059_vm6 = vcmp.eq.s32.totalorder %v1058_v55, %v2237_v30 }
 0x128   : > { %719 = vmatpush.bf16.msra.mxu3 %v2112_v34  ;;  %1601 = vmatmul.msk.bf16.vlgmr.msrb.gmra.mxu0 %vm2398_vm7, %v1910_v35 }
 0x129   : > { %1027 = vmatpush.bf16.msrb.mxu0 %v2046_v11  ;;  %v950_v1 = vpop.permute.xlu0 %949 }
 0x12a   : > { %1566 = vmatmul.msk.bf16.vlgmr.msrb.gmra.mxu2 %vm1565_vm12, %v1910_v35  ;;  %1568 = vmatmul.msk.bf16.vlgmr.msrb.gmra.mxu3 %vm1565_vm12, %v1910_v35  ;;  %vm951_vm10 = vcmp.eq.s32.totalorder %v950_v1, %v2237_v30  ;;  %vm915_vm12 = vcmp.eq.s32.totalorder %v914_v0, %v2237_v30 }
 0x12b   : > { %685 = vmatpush.bf16.msra.mxu1 %v2159_v54  ;;  %707 = vmatpush.bf16.msra.mxu2 %v2133_v40  ;;  %vm2451_vm11 = vmpackc.low %vm951_vm10, %vm951_vm10 }
 0x12c   : > { %720 = vmatpush.bf16.msra.mxu3 %v2135_v41  ;;  %vm1605_vm13 = vmpackc.low %vm915_vm12, %vm915_vm12  ;;  %v678_v20 = vpop.f32.mrf.mxu0 }
 0x12d   : > { %1028 = vmatpush.bf16.msrb.mxu0 %v2067_v18 }
 0x12f   : > { %686 = vmatpush.bf16.msra.mxu1 %v2178_v59  ;;  %708 = vmatpush.bf16.msra.mxu2 %v2153_v50 }
 0x130   : > { %721 = vmatpush.bf16.msra.mxu3 %v2159_v54 }
 0x131   : > { %1029 = vmatpush.bf16.msrb.mxu0 %v2086_v24 }
 0x133   : > { %687 = vmatpush.bf16.msra.mxu1 %v2199_v6  ;;  %709 = vmatpush.bf16.msra.mxu2 %v2175_v58 }
 0x134   : > { %722 = vmatpush.bf16.msra.mxu3 %v2178_v59  ;;  %v2527_v36 = vpop.f32.mrf.mxu0 }
 0x135   : > { %1030 = vmatpush.bf16.msrb.mxu0 %v2110_v33 }
 0x136   : > { %1573 = vmatmul.msk.bf16.vlgmr.msra.gmra.mxu1 %vm2260_vm8, %v1910_v35  ;;  %vm843_vm8 = vcmp.eq.s32.totalorder %v842_v62, %v2237_v30 }
 0x137   : > { %752 = vmatpush.bf16.msrb.mxu1 %v2048_v12  ;;  %710 = vmatpush.bf16.msra.mxu2 %v2195_v3  ;;  %vm1595_vm9 = vmpackc.low %vm843_vm8, %vm843_vm8 }
 0x138   : > { %723 = vmatpush.bf16.msra.mxu3 %v2199_v6  ;;  %1611 = vmatmul.msk.bf16.vlgmr.msra.gmra.mxu0 %vm2451_vm11, %v1910_v35 }
 0x139   : > { %1031 = vmatpush.bf16.msrb.mxu0 %v2133_v40 }
 0x13a   : > { %1576 = vmatmul.msk.bf16.vlgmr.msra.gmra.mxu2 %vm1575_vm1, %v1910_v35 }
 0x13b   : > { %753 = vmatpush.bf16.msrb.mxu1 %v2069_v19  ;;  %775 = vmatpush.bf16.msrb.mxu2 %v2046_v11 }
 0x13c   : > { %788 = vmatpush.bf16.msrb.mxu3 %v2048_v12  ;;  %v750_v45 = vpop.f32.mrf.mxu0 }
 0x13d   : > { %1578 = vmatmul.msk.bf16.vlgmr.msra.gmra.mxu3 %vm1575_vm1, %v1910_v35  ;;  %1032 = vmatpush.bf16.msrb.mxu0 %v2153_v50 }
 0x13f   : > { %754 = vmatpush.bf16.msrb.mxu1 %v2088_v25  ;;  %776 = vmatpush.bf16.msrb.mxu2 %v2067_v18 }
 0x140   : > { %789 = vmatpush.bf16.msrb.mxu3 %v2069_v19 }
 0x141   : > { %1033 = vmatpush.bf16.msrb.mxu0 %v2175_v58 }
 0x143   : > { %755 = vmatpush.bf16.msrb.mxu1 %v2112_v34  ;;  %777 = vmatpush.bf16.msrb.mxu2 %v2086_v24 }
 0x144   : > { %790 = vmatpush.bf16.msrb.mxu3 %v2088_v25 }
 0x145   : > { %1034 = vmatpush.bf16.msrb.mxu0 %v2195_v3 }
 0x147   : > { %756 = vmatpush.bf16.msrb.mxu1 %v2135_v41  ;;  %778 = vmatpush.bf16.msrb.mxu2 %v2110_v33 }
 0x148   : > { %791 = vmatpush.bf16.msrb.mxu3 %v2112_v34 }
 0x149   : > { %1099 = vmatpush.bf16.msra.mxu0 %v2046_v11 }
 0x14b   : > { %757 = vmatpush.bf16.msrb.mxu1 %v2159_v54  ;;  %779 = vmatpush.bf16.msrb.mxu2 %v2133_v40 }
 0x14c   : > { %792 = vmatpush.bf16.msrb.mxu3 %v2135_v41 }
 0x14d   : > { %1100 = vmatpush.bf16.msra.mxu0 %v2067_v18 }
 0x14f   : > { %758 = vmatpush.bf16.msrb.mxu1 %v2178_v59  ;;  %780 = vmatpush.bf16.msrb.mxu2 %v2153_v50 }
 0x150   : > { %793 = vmatpush.bf16.msrb.mxu3 %v2159_v54 }
 0x151   : > { %1101 = vmatpush.bf16.msra.mxu0 %v2086_v24 }
 0x153   : > { %759 = vmatpush.bf16.msrb.mxu1 %v2199_v6  ;;  %781 = vmatpush.bf16.msrb.mxu2 %v2175_v58 }
 0x154   : > { %794 = vmatpush.bf16.msrb.mxu3 %v2178_v59  ;;  %v820_v60 = vpop.f32.mrf.mxu0 }
 0x155   : > { %1102 = vmatpush.bf16.msra.mxu0 %v2110_v33 }
 0x156   : > { %1583 = vmatmul.msk.bf16.vlgmr.msrb.gmra.mxu1 %vm2303_vm14, %v1910_v35  ;;  %vm584_vm14 = vcmask 1043456  }
 0x157   : > { %824 = vmatpush.bf16.msra.mxu1 %v2048_v12  ;;  %782 = vmatpush.bf16.msrb.mxu2 %v2195_v3  ;;  %vm2486_vm1 = vmor %vm585_vm15, %vm584_vm14  ;;  %vm1374_vm14 = vcmask 523264  }
 0x158   : > { %795 = vmatpush.bf16.msrb.mxu3 %v2199_v6 }
 0x159   : > { %1103 = vmatpush.bf16.msra.mxu0 %v2133_v40 }
 0x15a   : > { %1586 = vmatmul.msk.bf16.vlgmr.msrb.gmra.mxu2 %vm1585_vm5, %v1910_v35 }
 0x15b   : > { %825 = vmatpush.bf16.msra.mxu1 %v2069_v19  ;;  %847 = vmatpush.bf16.msra.mxu2 %v2046_v11 }
 0x15c   : > { %860 = vmatpush.bf16.msra.mxu3 %v2048_v12  ;;  %v822_v61 = vpop.f32.mrf.mxu0 }
 0x15d   : > { %1588 = vmatmul.msk.bf16.vlgmr.msrb.gmra.mxu3 %vm1585_vm5, %v1910_v35  ;;  %vm1615_vm5 = vmpackc.low %vm987_vm4, %vm987_vm4  ;;  %1104 = vmatpush.bf16.msra.mxu0 %v2153_v50 }
 0x15f   : > { %826 = vmatpush.bf16.msra.mxu1 %v2088_v25  ;;  %848 = vmatpush.bf16.msra.mxu2 %v2067_v18 }
 0x160   : > { %861 = vmatpush.bf16.msra.mxu3 %v2069_v19 }
 0x161   : > { %1105 = vmatpush.bf16.msra.mxu0 %v2175_v58 }
 0x163   : > { %827 = vmatpush.bf16.msra.mxu1 %v2112_v34  ;;  %849 = vmatpush.bf16.msra.mxu2 %v2086_v24 }
 0x164   : > { %862 = vmatpush.bf16.msra.mxu3 %v2088_v25 }
 0x165   : > { %1106 = vmatpush.bf16.msra.mxu0 %v2195_v3 }
 0x167   : > { %828 = vmatpush.bf16.msra.mxu1 %v2135_v41  ;;  %850 = vmatpush.bf16.msra.mxu2 %v2110_v33 }
 0x168   : > { %863 = vmatpush.bf16.msra.mxu3 %v2112_v34 }
 0x16b   : > { %829 = vmatpush.bf16.msra.mxu1 %v2159_v54  ;;  %851 = vmatpush.bf16.msra.mxu2 %v2133_v40 }
 0x16c   : > { %864 = vmatpush.bf16.msra.mxu3 %v2135_v41 }
 0x16f   : > { %830 = vmatpush.bf16.msra.mxu1 %v2178_v59  ;;  %852 = vmatpush.bf16.msra.mxu2 %v2153_v50 }
 0x170   : > { %865 = vmatpush.bf16.msra.mxu3 %v2159_v54 }
 0x173   : > { %831 = vmatpush.bf16.msra.mxu1 %v2199_v6  ;;  %853 = vmatpush.bf16.msra.mxu2 %v2175_v58 }
 0x174   : > { %866 = vmatpush.bf16.msra.mxu3 %v2178_v59 }
 0x176   : > { %1593 = vmatmul.msk.bf16.vlgmr.msra.gmra.mxu1 %vm2353_vm3, %v1910_v35  ;;  %vm2506_vm3 = vmpackc.low %vm1023_vm2, %vm1023_vm2 }
 0x177   : > { %896 = vmatpush.bf16.msrb.mxu1 %v2048_v12  ;;  %854 = vmatpush.bf16.msra.mxu2 %v2195_v3 }
 0x178   : > { %867 = vmatpush.bf16.msra.mxu3 %v2199_v6  ;;  %1621 = vmatmul.msk.bf16.vlgmr.msrb.gmra.mxu0 %vm2506_vm3, %v1910_v35 }
 0x17a   : > { %1596 = vmatmul.msk.bf16.vlgmr.msra.gmra.mxu2 %vm1595_vm9, %v1910_v35 }
 0x17b   : > { %897 = vmatpush.bf16.msrb.mxu1 %v2069_v19  ;;  %919 = vmatpush.bf16.msrb.mxu2 %v2046_v11 }
 0x17c   : > { %932 = vmatpush.bf16.msrb.mxu3 %v2048_v12 }
 0x17d   : > { %1598 = vmatmul.msk.bf16.vlgmr.msra.gmra.mxu3 %vm1595_vm9, %v1910_v35 }
 0x17f   : > { %898 = vmatpush.bf16.msrb.mxu1 %v2088_v25  ;;  %920 = vmatpush.bf16.msrb.mxu2 %v2067_v18 }
 0x180   : > { %933 = vmatpush.bf16.msrb.mxu3 %v2069_v19 }
 0x183   : > { %899 = vmatpush.bf16.msrb.mxu1 %v2112_v34  ;;  %921 = vmatpush.bf16.msrb.mxu2 %v2086_v24 }
 0x184   : > { %934 = vmatpush.bf16.msrb.mxu3 %v2088_v25 }
 0x187   : > { %900 = vmatpush.bf16.msrb.mxu1 %v2135_v41  ;;  %922 = vmatpush.bf16.msrb.mxu2 %v2110_v33 }
 0x188   : > { %935 = vmatpush.bf16.msrb.mxu3 %v2112_v34 }
 0x18b   : > { %901 = vmatpush.bf16.msrb.mxu1 %v2159_v54  ;;  %923 = vmatpush.bf16.msrb.mxu2 %v2133_v40 }
 0x18c   : > { %936 = vmatpush.bf16.msrb.mxu3 %v2135_v41 }
 0x18f   : > { %902 = vmatpush.bf16.msrb.mxu1 %v2178_v59  ;;  %924 = vmatpush.bf16.msrb.mxu2 %v2153_v50 }
 0x190   : > { %937 = vmatpush.bf16.msrb.mxu3 %v2159_v54 }
 0x193   : > { %903 = vmatpush.bf16.msrb.mxu1 %v2199_v6  ;;  %925 = vmatpush.bf16.msrb.mxu2 %v2175_v58  ;;  %v2472_v8 = vpop.f32.mrf.mxu1 }
 0x194   : > { %938 = vmatpush.bf16.msrb.mxu3 %v2178_v59 }
 0x196   : > { %1603 = vmatmul.msk.bf16.vlgmr.msrb.gmra.mxu1 %vm2398_vm7, %v1910_v35  ;;  %vm1625_vm7 = vmpackc.low %vm1059_vm6, %vm1059_vm6 }
 0x197   : > { %968 = vmatpush.bf16.msra.mxu1 %v2048_v12  ;;  %926 = vmatpush.bf16.msrb.mxu2 %v2195_v3 }
 0x198   : > { %939 = vmatpush.bf16.msrb.mxu3 %v2199_v6 }
 0x19a   : > { %1606 = vmatmul.msk.bf16.vlgmr.msrb.gmra.mxu2 %vm1605_vm13, %v1910_v35 }
 0x19b   : > { %969 = vmatpush.bf16.msra.mxu1 %v2069_v19  ;;  %991 = vmatpush.bf16.msra.mxu2 %v2046_v11  ;;  %v421_v10 = vpop.f32.mrf.mxu1 }
 0x19c   : > { %1004 = vmatpush.bf16.msra.mxu3 %v2048_v12 }
 0x19d   : > { %1608 = vmatmul.msk.bf16.vlgmr.msrb.gmra.mxu3 %vm1605_vm13, %v1910_v35  ;;  %v566_v14 = vpop.f32.mrf.mxu2  ;;  %v579_v15 = vpop.f32.mrf.mxu3 }
 0x19e   : > { %v583_v17 = vpack.c.bf16 %v579_v15, %v566_v14 }
 0x19f   : > { %970 = vmatpush.bf16.msra.mxu1 %v2088_v25  ;;  %992 = vmatpush.bf16.msra.mxu2 %v2067_v18 }
 0x1a0   : > { %1005 = vmatpush.bf16.msra.mxu3 %v2069_v19  ;;  %587 = vst.msk [vmem:[#allocation2] sm:$0xff] %vm2486_vm1, %v583_v17 }
 0x1a3   : > { %971 = vmatpush.bf16.msra.mxu1 %v2112_v34  ;;  %993 = vmatpush.bf16.msra.mxu2 %v2086_v24  ;;  %v617_v21 = vpop.f32.mrf.mxu1 }
 0x1a4   : > { %1006 = vmatpush.bf16.msra.mxu3 %v2088_v25  ;;  %v621_v22 = vpack.c.bf16 %v617_v21, %v2440_v63 }
 0x1a5   : > { %v568_v27 = vpop.f32.mrf.mxu2  ;;  %v581_v2 = vpop.f32.mrf.mxu3 }
 0x1a6   : > { %623 = vst.msk [vmem:[#allocation2 + $0x8] sm:$0xff] %vm2486_vm1, %v621_v22  ;;  %v892_v10 = vpop.f32.mrf.mxu0 }
 0x1a7   : > { %972 = vmatpush.bf16.msra.mxu1 %v2135_v41  ;;  %994 = vmatpush.bf16.msra.mxu2 %v2110_v33 }
 0x1a8   : > { %1007 = vmatpush.bf16.msra.mxu3 %v2112_v34 }
 0x1ab   : > { %973 = vmatpush.bf16.msra.mxu1 %v2159_v54  ;;  %995 = vmatpush.bf16.msra.mxu2 %v2133_v40  ;;  %v619_v29 = vpop.f32.mrf.mxu1 }
 0x1ac   : > { %1008 = vmatpush.bf16.msra.mxu3 %v2135_v41 }
 0x1ad   : > { %v640_v4 = vpop.f32.mrf.mxu2  ;;  %v653_v31 = vpop.f32.mrf.mxu3  ;;  %v2539_v38 = vld [vmem:[#allocation2 + $0x8] sm:$0xf] }
 0x1ae   : > { %v657_v32 = vpack.c.bf16 %v653_v31, %v640_v4  ;;  %v1131_v44 = vunpack.c.l.bf16 %v2539_v38 }
 0x1af   : > { %974 = vmatpush.bf16.msra.mxu1 %v2178_v59  ;;  %996 = vmatpush.bf16.msra.mxu2 %v2153_v50 }
 0x1b0   : > { %1009 = vmatpush.bf16.msra.mxu3 %v2159_v54  ;;  %659 = vst.msk [vmem:[#allocation2 + $0x10] sm:$0xff] %vm2486_vm1, %v657_v32 }
 0x1b3   : > { %997 = vmatpush.bf16.msra.mxu2 %v2175_v58  ;;  %975 = vmatpush.bf16.msra.mxu1 %v2199_v6  ;;  %v689_v37 = vpop.f32.mrf.mxu1 }
 0x1b4   : > { %1010 = vmatpush.bf16.msra.mxu3 %v2178_v59 }
 0x1b5   : > { %v642_v39 = vpop.f32.mrf.mxu2  ;;  %v655_v43 = vpop.f32.mrf.mxu3 }
 0x1b6   : > { %1613 = vmatmul.msk.bf16.vlgmr.msra.gmra.mxu1 %vm2451_vm11, %v1910_v35 }
 0x1b7   : > { %1040 = vmatpush.bf16.msrb.mxu1 %v2048_v12  ;;  %998 = vmatpush.bf16.msra.mxu2 %v2195_v3 }
 0x1b8   : > { %1011 = vmatpush.bf16.msra.mxu3 %v2199_v6 }
 0x1ba   : > { %1616 = vmatmul.msk.bf16.vlgmr.msra.gmra.mxu2 %vm1615_vm5, %v1910_v35 }
 0x1bb   : > { %1041 = vmatpush.bf16.msrb.mxu1 %v2069_v19  ;;  %1063 = vmatpush.bf16.msrb.mxu2 %v2046_v11  ;;  %v693_v11 = vpack.c.bf16 %v689_v37, %v2477_v9  ;;  %v691_v48 = vpop.f32.mrf.mxu1 }
 0x1bc   : > { %1076 = vmatpush.bf16.msrb.mxu3 %v2048_v12  ;;  %v1094_v48 = vpop.permute.xlu1 %1093 }
 0x1bd   : > { %1618 = vmatmul.msk.bf16.vlgmr.msra.gmra.mxu3 %vm1615_vm5, %v1910_v35  ;;  %695 = vst.msk [vmem:[#allocation2 + $0x18] sm:$0xff] %vm2486_vm1, %v693_v11  ;;  %vm1095_vm8 = vcmp.eq.s32.totalorder %v1094_v48, %v2237_v30 }
 0x1be   : > { %vm1630_vm9 = vmpackc.low %vm1095_vm8, %vm1095_vm8 }
 0x1bf   : > { %1042 = vmatpush.bf16.msrb.mxu1 %v2088_v25  ;;  %1064 = vmatpush.bf16.msrb.mxu2 %v2067_v18  ;;  %v1137_v18 = vld [vmem:[#allocation2 + $0x10] sm:$0xf] }
 0x1c0   : > { %1077 = vmatpush.bf16.msrb.mxu3 %v2069_v19  ;;  %v2549_v46 = vunpack.c.l.bf16 %v1137_v18  ;;  %v725_v51 = vpop.f32.mrf.mxu3  ;;  %1631 = vmatmul.msk.bf16.vlgmr.msra.gmra.mxu0 %vm1630_vm9, %v1910_v35 }
 0x1c2   : > { %v1733_v47 = vpack.i.bf16 %v2549_v46, %v1131_v44 }
 0x1c3   : > { %1043 = vmatpush.bf16.msrb.mxu1 %v2112_v34  ;;  %1065 = vmatpush.bf16.msrb.mxu2 %v2086_v24  ;;  %v712_v24 = vpop.f32.mrf.mxu2 }
 0x1c4   : > { %1078 = vmatpush.bf16.msrb.mxu3 %v2088_v25  ;;  %1734 = vrot.lane.b32.xlu2 %v1733_v47, %s1906_s10  ;;  %v1144_v49 = vld [vmem:[#allocation2 + $0x18] sm:$0xf]  ;;  %v729_v53 = vpack.c.bf16 %v725_v51, %v712_v24 }
 0x1c5   : > { %v2561_v52 = vunpack.c.l.bf16 %v1144_v49 }
 0x1c6   : > { %731 = vst.msk [vmem:[#allocation2 + $0x20] sm:$0xff] %vm2486_vm1, %v729_v53 }
 0x1c7   : > { %1044 = vmatpush.bf16.msrb.mxu1 %v2135_v41  ;;  %1066 = vmatpush.bf16.msrb.mxu2 %v2110_v33  ;;  %v1738_v33 = vpack.i.bf16 %v2561_v52, %v2549_v46 }
 0x1c8   : > { %1079 = vmatpush.bf16.msrb.mxu3 %v2112_v34  ;;  %v727_v56 = vpop.f32.mrf.mxu3 }
 0x1c9   : > { %1739 = vrot.lane.b32.xlu0 %v1738_v33, %s1917_s23 }
 0x1cb   : > { %1045 = vmatpush.bf16.msrb.mxu1 %v2159_v54  ;;  %1067 = vmatpush.bf16.msrb.mxu2 %v2133_v40  ;;  %v714_v40 = vpop.f32.mrf.mxu2 }
 0x1cc   : > { %1080 = vmatpush.bf16.msrb.mxu3 %v2135_v41 }
 0x1cd   : > { %v2577_v57 = vld [vmem:[#allocation2 + $0x20] sm:$0xff]  }
 0x1cf   : > { %1046 = vmatpush.bf16.msrb.mxu1 %v2178_v59  ;;  %1068 = vmatpush.bf16.msrb.mxu2 %v2153_v50  ;;  %v2584_v50 = vunpack.c.l.bf16 %v2577_v57 }
 0x1d0   : > { %1081 = vmatpush.bf16.msrb.mxu3 %v2159_v54 }
 0x1d3   : > { %1047 = vmatpush.bf16.msrb.mxu1 %v2199_v6  ;;  %1069 = vmatpush.bf16.msrb.mxu2 %v2175_v58  ;;  %v1743_v58 = vpack.i.bf16 %v2584_v50, %v2561_v52 }
 0x1d4   : > { %1082 = vmatpush.bf16.msrb.mxu3 %v2178_v59 }
 0x1d5   : > { %1744 = vrot.lane.b32.xlu1 %v1743_v58, %s1906_s10  ;;  %1749 = vrot.lane.b32.xlu2 %v1743_v58, %s1918_s24 }
 0x1d6   : > { %1623 = vmatmul.msk.bf16.vlgmr.msrb.gmra.mxu1 %vm2506_vm3, %v1910_v35 }
 0x1d7   : > { %1112 = vmatpush.bf16.msra.mxu1 %v2048_v12  ;;  %1070 = vmatpush.bf16.msrb.mxu2 %v2195_v3  ;;  %v761_v12 = vpop.f32.mrf.mxu1 }
 0x1d8   : > { %1083 = vmatpush.bf16.msrb.mxu3 %v2199_v6  ;;  %v765_v3 = vpack.c.bf16 %v761_v12, %v2527_v36 }
 0x1da   : > { %1626 = vmatmul.msk.bf16.vlgmr.msrb.gmra.mxu2 %vm1625_vm7, %v1910_v35  ;;  %767 = vst.msk [vmem:[#allocation2 + $0x28] sm:$0xff] %vm2486_vm1, %v765_v3 }
 0x1db   : > { %1113 = vmatpush.bf16.msra.mxu1 %v2069_v19  ;;  %1628 = vmatmul.msk.bf16.vlgmr.msrb.gmra.mxu3 %vm1625_vm7, %v1910_v35 }
 0x1dd   : > { %v784_v63 = vpop.f32.mrf.mxu2 }
 0x1df   : > { %1114 = vmatpush.bf16.msra.mxu1 %v2088_v25  ;;  %v763_v19 = vpop.f32.mrf.mxu1 }
 0x1e0   : > { %v797_v0 = vpop.f32.mrf.mxu3 }
 0x1e1   : > { %v2601_v62 = vld [vmem:[#allocation2 + $0x28] sm:$0xff]   ;;  %v801_v5 = vpack.c.bf16 %v797_v0, %v784_v63 }
 0x1e2   : > { %v2604_v1 = vunpack.c.l.bf16 %v2601_v62 }
 0x1e3   : > { %1115 = vmatpush.bf16.msra.mxu1 %v2112_v34  ;;  %803 = vst.msk [vmem:[#allocation2 + $0x30] sm:$0xff] %vm2486_vm1, %v801_v5 }
 0x1e4   : > { %v1753_v25 = vpack.i.bf16 %v2604_v1, %v2584_v50 }
 0x1e5   : > { %v786_v34 = vpop.f32.mrf.mxu2 }
 0x1e6   : > { %1754 = vrot.lane.b32.xlu0 %v1753_v25, %s1917_s23 }
 0x1e7   : > { %1116 = vmatpush.bf16.msra.mxu1 %v2135_v41 }
 0x1e8   : > { %v799_v41 = vpop.f32.mrf.mxu3 }
 0x1ea   : > { %v2614_v7 = vld [vmem:[#allocation2 + $0x30] sm:$0xff]  }
 0x1eb   : > { %1117 = vmatpush.bf16.msra.mxu1 %v2159_v54  ;;  %v2617_v9 = vunpack.c.l.bf16 %v2614_v7 }
 0x1ed   : > { %v1763_v54 = vpack.i.bf16 %v2617_v9, %v2604_v1 }
 0x1ef   : > { %1118 = vmatpush.bf16.msra.mxu1 %v2178_v59  ;;  %1764 = vrot.lane.b32.xlu2 %v1763_v54, %s1906_s10  ;;  %v894_v59 = vpop.f32.mrf.mxu0 }
 0x1f0   : > { %1759 = vrot.lane.b32.xlu1 %v1763_v54, %s1918_s24 }
 0x1f3   : > { %1119 = vmatpush.bf16.msra.mxu1 %v2199_v6  ;;  %v833_v13 = vpop.f32.mrf.mxu1 }
 0x1f4   : > { %v837_v14 = vpack.c.bf16 %v833_v13, %v820_v60 }
 0x1f6   : > { %839 = vst.msk [vmem:[#allocation2 + $0x38] sm:$0xff] %vm2486_vm1, %v837_v14  ;;  %1633 = vmatmul.msk.bf16.vlgmr.msra.gmra.mxu1 %vm1630_vm9, %v1910_v35  ;;  %v1128_v35 = vld [vmem:[#allocation2] sm:$0xf] }
 0x1f7   : > { %v964_v4 = vpop.f32.mrf.mxu0  ;;  %v1129_v19 = vunpack.c.l.bf16 %v1128_v35 }
 0x1fb   : > { %v835_v6 = vpop.f32.mrf.mxu1 }
 0x1fd   : > { %v856_v15 = vpop.f32.mrf.mxu2  ;;  %v2625_v17 = vld [vmem:[#allocation2 + $0x38] sm:$0xff]  }
 0x1fe   : > { %v2628_v21 = vunpack.c.l.bf16 %v2625_v17 }
 0x1ff   : > { %v966_v36 = vpop.f32.mrf.mxu0 }
 0x200   : > { %v869_v20 = vpop.f32.mrf.mxu3  ;;  %v1768_v23 = vpack.i.bf16 %v2628_v21, %v2617_v9 }
 0x201   : > { %v873_v22 = vpack.c.bf16 %v869_v20, %v856_v15 }
 0x202   : > { %1769 = vrot.lane.b32.xlu0 %v1768_v23, %s1917_s23 }
 0x203   : > { %875 = vst.msk [vmem:[#allocation2 + $0x40] sm:$0xff] %vm2486_vm1, %v873_v22 }
 0x205   : > { %v858_v26 = vpop.f32.mrf.mxu2 }
 0x206   : > { %v1170_v26 = vunpack.c.h.bf16 %v2601_v62 }
 0x207   : > { %v1036_v30 = vpop.f32.mrf.mxu0 }
 0x208   : > { %v871_v27 = vpop.f32.mrf.mxu3 }
 0x20a   : > { %v2635_v2 = vld [vmem:[#allocation2 + $0x40] sm:$0xff]  }
 0x20b   : > { %v2638_v28 = vunpack.c.l.bf16 %v2635_v2 }
 0x20d   : > { %v1778_v29 = vpack.i.bf16 %v2638_v28, %v2628_v21 }
 0x20f   : > { %1779 = vrot.lane.b32.xlu2 %v1778_v29, %s1906_s10  ;;  %1774 = vrot.lane.b32.xlu1 %v1778_v29, %s1918_s24  ;;  %v1038_v58 = vpop.f32.mrf.mxu0 }
 0x213   : > { %v905_v31 = vpop.f32.mrf.mxu1 }
 0x214   : > { %v909_v32 = vpack.c.bf16 %v905_v31, %v892_v10 }
 0x216   : > { %911 = vst.msk [vmem:[#allocation2 + $0x48] sm:$0xff] %vm2486_vm1, %v909_v32 }
 0x21b   : > { %v907_v37 = vpop.f32.mrf.mxu1 }
 0x21d   : > { %v2646_v11 = vld [vmem:[#allocation2 + $0x48] sm:$0xff]   ;;  %v928_v39 = vpop.f32.mrf.mxu2 }
 0x21e   : > { %v2649_v45 = vunpack.c.l.bf16 %v2646_v11  ;;  %v1735_v55 = vpop.permute.xlu2 %1734 }
 0x21f   : > { %v1737_v60 = vunpack.i.h.bf16 %v1735_v55  ;;  %v1736_v12 = vunpack.i.l.bf16 %v1735_v55 }
 0x220   : > { %v941_v43 = vpop.f32.mrf.mxu3  ;;  %v1783_v47 = vpack.i.bf16 %v2649_v45, %v2638_v28 }
 0x221   : > { %v945_v18 = vpack.c.bf16 %v941_v43, %v928_v39  ;;  %v1157_v5 = vadd.f32 %v1737_v60, %v1131_v44  ;;  %v1136_v25 = vadd.f32 %v1736_v12, %v1129_v19  ;;  %v1152_v44 = vunpack.c.h.bf16 %v2577_v57  ;;  %v1825_v39 = vld [vmem:[%s2776_s6] ss:$0 sm:$0xff] }
 0x222   : > { %1784 = vrot.lane.b32.xlu0 %v1783_v47, %s1917_s23  ;;  %v2694_v57 = vadd.f32 %v1825_v39, %v2472_v8 }
 0x223   : > { %947 = vst.msk [vmem:[#allocation2 + $0x50] sm:$0xff] %vm2486_vm1, %v945_v18 }
 0x224   : > { %v442_v47 = vmax.f32 %v2694_v57, 0.0 }
 0x225   : > { %v930_v24 = vpop.f32.mrf.mxu2 }
 0x228   : > { %v943_v49 = vpop.f32.mrf.mxu3 }
 0x22a   : > { %v2659_v51 = vld [vmem:[#allocation2 + $0x50] sm:$0xff]  }
 0x22b   : > { %v2662_v53 = vunpack.c.l.bf16 %v2659_v51 }
 0x22d   : > { %v1793_v33 = vpack.i.bf16 %v2662_v53, %v2649_v45 }
 0x22f   : > { %1794 = vrot.lane.b32.xlu2 %v1793_v33, %s1906_s10  ;;  %1789 = vrot.lane.b32.xlu1 %v1793_v33, %s1918_s24  ;;  %v1750_v3 = vpop.permute.xlu2 %1749 }
 0x230   : > { %v1752_v10 = vunpack.i.h.bf16 %v1750_v3  ;;  %v1751_v6 = vunpack.i.l.bf16 %v1750_v3 }
 0x233   : > { %v977_v40 = vpop.f32.mrf.mxu1 }
 0x234   : > { %v981_v56 = vpack.c.bf16 %v977_v40, %v964_v4 }
 0x236   : > { %983 = vst.msk [vmem:[#allocation2 + $0x58] sm:$0xff] %vm2486_vm1, %v981_v56 }
 0x23b   : > { %v979_v61 = vpop.f32.mrf.mxu1  ;;  %v1740_v41 = vpop.permute.xlu0 %1739 }
 0x23c   : > { %v1742_v14 = vunpack.i.h.bf16 %v1740_v41  ;;  %v1741_v59 = vunpack.i.l.bf16 %v1740_v41 }
 0x23d   : > { %v1000_v63 = vpop.f32.mrf.mxu2  ;;  %v2670_v0 = vld [vmem:[#allocation2 + $0x58] sm:$0xff]  }
 0x23e   : > { %v2675_v54 = vunpack.c.l.bf16 %v2670_v0  ;;  %v1161_v20 = vadd.f32 %v1742_v14, %v1157_v5  ;;  %v1143_v38 = vadd.f32 %v1741_v59, %v1136_v25 }
 0x240   : > { %v1013_v34 = vpop.f32.mrf.mxu3  ;;  %v1798_v15 = vpack.i.bf16 %v2675_v54, %v2662_v53  ;;  %v1150_v22 = vadd.f32 %v1751_v6, %v1143_v38  ;;  %v1168_v23 = vadd.f32 %v1752_v10, %v1161_v20  ;;  %v1189_v6 = vunpack.c.h.bf16 %v2614_v7 }
 0x241   : > { %v1017_v13 = vpack.c.bf16 %v1013_v34, %v1000_v63 }
 0x242   : > { %1799 = vrot.lane.b32.xlu0 %v1798_v15, %s1917_s23  ;;  %v1153_v27 = vadd.f32 %v1152_v44, %v1150_v22  ;;  %v1171_v29 = vadd.f32 %v1170_v26, %v1168_v23 }
 0x243   : > { %1019 = vst.msk [vmem:[#allocation2 + $0x60] sm:$0xff] %vm2486_vm1, %v1017_v13 }
 0x244   : > { %v1172_v32 = vmax.f32 %v1153_v27, %v1171_v29 }
 0x245   : > { %v1002_v4 = vpop.f32.mrf.mxu2 }
 0x247   : > { %v1745_v8 = vpop.permute.xlu1 %1744 }
 0x248   : > { %v1015_v31 = vpop.f32.mrf.mxu3  ;;  %v1747_v35 = vunpack.i.h.bf16 %v1745_v8  ;;  %v1746_v58 = vunpack.i.l.bf16 %v1745_v8 }
 0x249   : > { %v1765_v23 = vpop.permute.xlu2 %1764 }
 0x24a   : > { %v2684_v36 = vld [vmem:[#allocation2 + $0x60] sm:$0xff]   ;;  %v1195_v19 = vadd.f32 %v1747_v35, %v2561_v52  ;;  %v1176_v63 = vadd.f32 %v1746_v58, %v2549_v46  ;;  %v1208_v52 = vunpack.c.h.bf16 %v2625_v17  ;;  %v1767_v27 = vunpack.i.h.bf16 %v1765_v23 }
 0x24b   : > { %v1315_v37 = vunpack.c.l.bf16 %v2684_v36  ;;  %v1766_v29 = vunpack.i.l.bf16 %v1765_v23  ;;  %v1227_v17 = vunpack.c.h.bf16 %v2635_v2  ;;  %v1303_v16 = vunpack.c.h.bf16 %v2684_v36 }
 0x24d   : > { %v1808_v43 = vpack.i.bf16 %v1315_v37, %v2675_v54  ;;  %v1214_v7 = vadd.f32 %v1766_v29, %v2584_v50 }
 0x24f   : > { %1809 = vrot.lane.b32.xlu2 %v1808_v43, %s1906_s10  ;;  %1804 = vrot.lane.b32.xlu1 %v1808_v43, %s1918_s24 }
 0x253   : > { %v1049_v62 = vpop.f32.mrf.mxu1 }
 0x254   : > { %v1053_v18 = vpack.c.bf16 %v1049_v62, %v1036_v30 }
 0x256   : > { %1055 = vst.msk [vmem:[#allocation2 + $0x68] sm:$0xff] %vm2486_vm1, %v1053_v18 }
 0x257   : > { %444 = vrot.lane.b32.xlu2 %v442_v47, %s1906_s10 }
 0x258   : > { %v1755_v30 = vpop.permute.xlu0 %1754 }
 0x259   : > { %v1757_v60 = vunpack.i.h.bf16 %v1755_v30  ;;  %v1756_v12 = vunpack.i.l.bf16 %v1755_v30 }
 0x25b   : > { %v1051_v48 = vpop.f32.mrf.mxu1  ;;  %v1199_v41 = vadd.f32 %v1757_v60, %v1195_v19  ;;  %v1180_v10 = vadd.f32 %v1756_v12, %v1176_v63 }
 0x25d   : > { %v2700_v24 = vld [vmem:[#allocation2 + $0x68] sm:$0xff]   ;;  %v1072_v49 = vpop.f32.mrf.mxu2 }
 0x25e   : > { %v1085_v33 = vpop.f32.mrf.mxu3  ;;  %v1334_v55 = vunpack.c.l.bf16 %v2700_v24 }
 0x25f   : > { %v1089_v40 = vpack.c.bf16 %v1085_v33, %v1072_v49  ;;  %v1246_v33 = vunpack.c.h.bf16 %v2646_v11  ;;  %v1265_v11 = vunpack.c.h.bf16 %v2659_v51 }
 0x260   : > { %v1813_v56 = vpack.i.bf16 %v1334_v55, %v1315_v37  ;;  %v1233_v37 = vadd.f32 %v1767_v27, %v2604_v1 }
 0x261   : > { %1091 = vst.msk [vmem:[#allocation2 + $0x70] sm:$0xff] %vm2486_vm1, %v1089_v40 }
 0x262   : > { %1814 = vrot.lane.b32.xlu0 %v1813_v56, %s1917_s23  ;;  %v1760_v25 = vpop.permute.xlu1 %1759  ;;  %s1389_s23 = sshll.u32 %s309_s22, 4  ;;  %s1390_s23 = int_to_ptr.vmem [resolvable:$true] %s1389_s23 }
 0x263   : > { %v1762_v13 = vunpack.i.h.bf16 %v1760_v25  ;;  %v1761_v14 = vunpack.i.l.bf16 %v1760_v25 }
 0x265   : > { %v1074_v3 = vpop.f32.mrf.mxu2  ;;  %v1187_v15 = vadd.f32 %v1761_v14, %v1180_v10  ;;  %v1206_v20 = vadd.f32 %v1762_v13, %v1199_v41  ;;  %v1284_v10 = vunpack.c.h.bf16 %v2670_v0 }
 0x266   : > { %v1087_v61 = vpop.f32.mrf.mxu3 }
 0x267   : > { %v1190_v38 = vadd.f32 %v1189_v6, %v1187_v15  ;;  %v1209_v44 = vadd.f32 %v1208_v52, %v1206_v20 }
 0x268   : > { %v2708_v5 = vld [vmem:[#allocation2 + $0x70] sm:$0xff]  }
 0x269   : > { %v1353_v34 = vunpack.c.l.bf16 %v2708_v5  ;;  %v1191_v46 = vmax.f32 %v1172_v32, %v1190_v38  ;;  %v1780_v8 = vpop.permute.xlu2 %1779 }
 0x26a   : > { %v1782_v1 = vunpack.i.h.bf16 %v1780_v8  ;;  %v1781_v35 = vunpack.i.l.bf16 %v1780_v8 }
 0x26b   : > { %v1818_v59 = vpack.i.bf16 %v1353_v34, %v1334_v55  ;;  %v1210_v22 = vmax.f32 %v1191_v46, %v1209_v44 }
 0x26c   : > { %v1271_v60 = vadd.f32 %v1782_v1, %v2628_v21  ;;  %v1252_v12 = vadd.f32 %v1781_v35, %v2617_v9 }
 0x26d   : > { %1819 = vrot.lane.b32.xlu1 %v1818_v59, %s1918_s24  ;;  %v1108_v59 = vpop.f32.mrf.mxu0 }
 0x273   : > { %v1121_v6 = vpop.f32.mrf.mxu1 }
 0x274   : > { %v1770_v26 = vpop.permute.xlu0 %1769  ;;  %v1125_v15 = vpack.c.bf16 %v1121_v6, %v1108_v59 }
 0x275   : > { %v1772_v4 = vunpack.i.h.bf16 %v1770_v26  ;;  %v1771_v31 = vunpack.i.l.bf16 %v1770_v26  ;;  %v1110_v9 = vpop.f32.mrf.mxu0 }
 0x276   : > { %1127 = vst.msk [vmem:[#allocation2 + $0x78] sm:$0xff] %vm2486_vm1, %v1125_v15 }
 0x277   : > { %v1237_v43 = vadd.f32 %v1772_v4, %v1233_v37  ;;  %v1218_v62 = vadd.f32 %v1771_v31, %v1214_v7 }
 0x27b   : > { %v1123_v20 = vpop.f32.mrf.mxu1 }
 0x27d   : > { %v1359_v36 = vld [vmem:[#allocation2 + $0x7c] sm:$0xf] }
 0x281   : > { %v1775_v39 = vpop.permute.xlu1 %1774 }
 0x282   : > { %v1777_v18 = vunpack.i.h.bf16 %v1775_v39  ;;  %v1776_v47 = vunpack.i.l.bf16 %v1775_v39 }
 0x284   : > { %v1225_v32 = vadd.f32 %v1776_v47, %v1218_v62  ;;  %v1244_v48 = vadd.f32 %v1777_v18, %v1237_v43  ;;  %v1322_v43 = vunpack.c.h.bf16 %v2700_v24  ;;  %v1341_v24 = vunpack.c.h.bf16 %v2708_v5 }
 0x286   : > { %v1228_v49 = vadd.f32 %v1227_v17, %v1225_v32  ;;  %v1247_v40 = vadd.f32 %v1246_v33, %v1244_v48 }
 0x288   : > { %v1229_v55 = vmax.f32 %v1210_v22, %v1228_v49 }
 0x289   : > { %v1795_v38 = vpop.permute.xlu2 %1794 }
 0x28a   : > { %v1248_v56 = vmax.f32 %v1229_v55, %v1247_v40  ;;  %v1797_v46 = vunpack.i.h.bf16 %v1795_v38  ;;  %v1796_v51 = vunpack.i.l.bf16 %v1795_v38 }
 0x28c   : > { %v1309_v23 = vadd.f32 %v1797_v46, %v2649_v45  ;;  %v1290_v0 = vadd.f32 %v1796_v51, %v2638_v28 }
 0x294   : > { %v1785_v30 = vpop.permute.xlu0 %1784 }
 0x295   : > { %v1787_v50 = vunpack.i.h.bf16 %v1785_v30  ;;  %v1786_v58 = vunpack.i.l.bf16 %v1785_v30 }
 0x297   : > { %v1275_v2 = vadd.f32 %v1787_v50, %v1271_v60  ;;  %v1256_v61 = vadd.f32 %v1786_v58, %v1252_v12  ;;  %v1360_v58 = vunpack.c.l.bf16 %v1359_v36 }
 0x2a1   : > { %v1790_v3 = vpop.permute.xlu1 %1789 }
 0x2a2   : > { %v1792_v19 = vunpack.i.h.bf16 %v1790_v3  ;;  %v1791_v63 = vunpack.i.l.bf16 %v1790_v3 }
 0x2a4   : > { %v1263_v25 = vadd.f32 %v1791_v63, %v1256_v61  ;;  %v1282_v34 = vadd.f32 %v1792_v19, %v1275_v2  ;;  %v1489_v19 = vmul.f32 -1.442695, %v2694_v57 }
 0x2a6   : > { %v1266_v41 = vadd.f32 %v1265_v11, %v1263_v25  ;;  %v1285_v14 = vadd.f32 %v1284_v10, %v1282_v34  ;;  %1831 = vpow2.f32 %v1489_v19 }
 0x2a8   : > { %v1267_v13 = vmax.f32 %v1248_v56, %v1266_v41 }
 0x2a9   : > { %v1810_v17 = vpop.permute.xlu2 %1809 }
 0x2aa   : > { %v1286_v21 = vmax.f32 %v1267_v13, %v1285_v14  ;;  %v1812_v45 = vunpack.i.h.bf16 %v1810_v17  ;;  %v1811_v48 = vunpack.i.l.bf16 %v1810_v17 }
 0x2ac   : > { %v1347_v33 = vadd.f32 %v1812_v45, %v2675_v54  ;;  %v1328_v55 = vadd.f32 %v1811_v48, %v2662_v53  ;;  %v1826_v54 = vld [vmem:[%s2777_s7] ss:$0 sm:$0xff]  ;;  %v1832_v5 = vpop.eup %1831 }
 0x2ad   : > { %v426_v63 = vadd.f32 1.0, %v1832_v5 }
 0x2af   : > { %1833 = vrcp.f32 %v426_v63  ;;  %v438_v13 = vand.u32 2147483648, %v426_v63  ;;  %vm432_vm11 = vweird.f32 %v426_v63  ;;  %v436_v14 = vand.u32 2147483647, %v426_v63 }
 0x2b1   : > { %v439_v6 = vor.u32 1.1754944e-38, %v438_v13  ;;  %vm437_vm13 = vcmp.eq.f32.partialorder %v436_v14, 8.507059e+37  ;;  %v445_v15 = vpop.permute.xlu2 %444 }
 0x2b4   : > { %v1800_v52 = vpop.permute.xlu0 %1799 }
 0x2b5   : > { %v1802_v44 = vunpack.i.h.bf16 %v1800_v52  ;;  %v1801_v22 = vunpack.i.l.bf16 %v1800_v52  ;;  %v1834_v11 = vpop.eup %1833 }
 0x2b6   : > { %v428_v25 = vmul.f32 %v1834_v11, %v426_v63  ;;  %vm433_vm10 = vweird.f32 %v1834_v11 }
 0x2b7   : > { %v1313_v27 = vadd.f32 %v1802_v44, %v1309_v23  ;;  %v1294_v29 = vadd.f32 %v1801_v22, %v1290_v0  ;;  %vm434_vm12 = vmor %vm432_vm11, %vm433_vm10 }
 0x2b8   : > { %v429_v34 = vsub.f32 1.0, %v428_v25 }
 0x2ba   : > { %v430_v41 = vmul.f32 %v1834_v11, %v429_v34 }
 0x2bc   : > { %v431_v10 = vadd.f32 %v1834_v11, %v430_v41 }
 0x2be   : > { %v435_v59 = vsel %vm434_vm12, %v1834_v11, %v431_v10 }
 0x2bf   : > { %v440_v57 = vsel %vm437_vm13, %v439_v6, %v435_v59 }
 0x2c0   : > { %v447_v9 = vmul.f32 %v445_v15, %v440_v57 }
 0x2c1   : > { %v1805_v26 = vpop.permute.xlu1 %1804 }
 0x2c2   : > { %v1807_v4 = vunpack.i.h.bf16 %v1805_v26  ;;  %v1806_v31 = vunpack.i.l.bf16 %v1805_v26 }
 0x2c4   : > { %v1301_v37 = vadd.f32 %v1806_v31, %v1294_v29  ;;  %v1320_v7 = vadd.f32 %v1807_v4, %v1313_v27 }
 0x2c6   : > { %v1304_v39 = vadd.f32 %v1303_v16, %v1301_v37  ;;  %v1323_v18 = vadd.f32 %v1322_v43, %v1320_v7 }
 0x2c8   : > { %v1305_v62 = vmax.f32 %v1286_v21, %v1304_v39  ;;  %v448_v21 = vsub.f32 1.0, %v440_v57 }
 0x2ca   : > { %v1324_v47 = vmax.f32 %v1305_v62, %v1323_v18  ;;  %v449_v20 = vmul.f32 %v448_v21, %v2252_v42 }
 0x2cc   : > { %v450_v38 = vadd.f32 %v449_v20, %v447_v9 }
 0x2d4   : > { %v1815_v32 = vpop.permute.xlu0 %1814 }
 0x2d5   : > { %v1817_v28 = vunpack.i.h.bf16 %v1815_v32  ;;  %v1816_v49 = vunpack.i.l.bf16 %v1815_v32 }
 0x2d7   : > { %v1351_v56 = vadd.f32 %v1817_v28, %v1347_v33  ;;  %v1332_v8 = vadd.f32 %v1816_v49, %v1328_v55 }
 0x2df   : > { %v1820_v40 = vpop.permute.xlu1 %1819 }
 0x2e0   : > { %v1822_v30 = vunpack.i.h.bf16 %v1820_v40  ;;  %v1821_v1 = vunpack.i.l.bf16 %v1820_v40 }
 0x2e2   : > { %v1339_v35 = vadd.f32 %v1821_v1, %v1332_v8  ;;  %v1358_v50 = vadd.f32 %v1822_v30, %v1351_v56 }
 0x2e4   : > { %v1342_v60 = vadd.f32 %v1341_v24, %v1339_v35  ;;  %v1361_v3 = vadd.f32 %v1360_v58, %v1358_v50 }
 0x2e6   : > { %v1343_v12 = vmax.f32 %v1324_v47, %v1342_v60 }
 0x2e8   : > { %v1362_v2 = vmax.f32 %v1343_v12, %v1361_v3 }
 0x2ea   : > { %v1367_v53 = vadd.f32 %v1826_v54, %v1362_v2 }
 0x2ec   : > { %v1368_v61 = vmax.f32 %v1367_v53, 0.0 }
 0x2ee   : > { %1370 = vrot.lane.b32.xlu0 %v1368_v61, %s1918_s24  ;;  %s1391_s24 = sshll.u32 %s1387_s21, 4  ;;  %s1392_s24 = int_to_ptr.hbm [resolvable:$true] %s1391_s24 }
 0x2ef   : > { %s1849_s25 = sshra.s32 %s1392_s24, 4  ;;  %s1850_s25 = int_to_ptr.hbm [resolvable:$true] %s1849_s25 }
 0x2f0   : > { %s1851_s26 = scalar_lea.hbm %s1850_s25, 8  ;;  %p1856_p0 = scmp.lt.s32.totalorder %s1850_s25, %s2778_s8 }
 0x2f1   : > { %p1852_p11 = scmp.ne.s32.totalorder %s1850_s25, %s1851_s26  ;;  %p1857_p1 = scmp.lt.s32.totalorder %s1855_s17, %s1851_s26 }
 0x2f3   : > { %p1853_p12 = pnand %p1852_p11, %p2002_p5  ;;  %p1858_p2 = por %p1857_p1, %p1856_p0 }
 0x2f5   : > { %p1854_p13 = pneg %p1853_p12 }
 0x2f7   : > { %p1859_p3 = pnand %p1858_p2, %p1854_p13 }
 0x360   : > { %v1371_v52 = vpop.permute.xlu0 %1370 }
 0x361   : > { %v1373_v46 = vsel %vm341_vm0, %v450_v38, %v1371_v52 }
 0x362   : > { %1375 = vst.msk [vmem:[%s309_s22] sm:$0xff] %vm1374_vm14, %v1373_v46 }
 0x363   : > { %1862 = shalt.err (!%p1859_p3)
}
 0x364   : > { %1658 = dma.vmem_to_hbm [thread:$0]  (%p2002_p5), %s1390_s23, 128, %s1392_s24, %s1377_s9  }
 0x365 PF: > { %p1664_p4 = scmp.ge.s32.totalorder %s1897_s30, 2  ;;  %s1403_s13 = sand.u32 1, %s1885_s27  }
 0x366   : > { %s1404_s20 = scalar_lea.sflag [#allocation4], %s1403_s13 }
 0x367   : > { %p1661_p7 = pnand %p1664_p4, %p2006_p6 }
 0x369   : > { %p1662_p8 = pneg %p1661_p7 }
 0x36b   : > { %1880 = dma.done.wait (%p1662_p8), %s1404_s20, 128  }
 0x36c   : > { %1882 = vsyncadd (%p1662_p8), %s1404_s20, 4294967168  ;;  %p18_p9 = scmp.ge.s32.totalorder %s1989_s11, 4   ;;  %s2797_s27 = smov %s1889_s28 }
 0x36d   : > { %s2798_s28 = smov %s1893_s29  ;;  %s2799_s29 = smov %s2000_s14 }
 0x36e   : > { %s2800_s30 = smov %s1989_s11  ;;  %20 = sbr.rel (!%p18_p9) target bundleno = 3 (0x3), region = 105 }
 0x373   :  { %1410 = vsyncpa [#allocation4], 1 }
 0x374   :  { %1412 = vsyncpa [#allocation4 + $0x1], 1 }

</bundles_post_ra>
